<compile_context>
chip_gen: v7x
topology: tpu7x:2x2x1
jax: 0.10.0
libtpu: 0.0.40
codegen_flags: <defaults>
</compile_context>

<pallas_src>
import functools
import math

import jax
import jax.numpy as jnp
import numpy as np
from jax.experimental import pallas as pl
from jax.experimental.pallas import tpu as pltpu

_NEG_INF = -1e30  # large finite negative: robust masked fill (no inf-inf NaN risk)


# ----------------------------- in-kernel math -------------------------------

def _recip(x, approx):
    return pl.reciprocal(x, approx=approx)


def _erf(x, approx):
    # Abramowitz & Stegun 7.1.26 polynomial (max abs err ~1.5e-7).
    a1, a2, a3, a4, a5 = 0.254829592, -0.284496736, 1.421413741, -1.453152027, 1.061405429
    p = 0.3275911
    s = jnp.where(x < 0.0, -1.0, 1.0)
    ax = jnp.abs(x)
    t = _recip(1.0 + p * ax, approx)      # divide moved to the EUP slot on perf path
    poly = ((((a5 * t + a4) * t + a3) * t + a2) * t + a1) * t
    return s * (1.0 - poly * jnp.exp(-ax * ax))


def _gelu_exact(x, approx):
    # nn.GELU() default is the exact (erf) formulation; f32 math on the VPU/EUP.
    return 0.5 * x * (1.0 + _erf(x * (1.0 / math.sqrt(2.0)), approx))


def _layernorm(h, w, b, approx):
    # Matches the custom LayerNorm: (x - mean) / (std_unbiased + 1e-5) * w + b
    n = h.shape[-1]
    mu = jnp.mean(h, axis=-1, keepdims=True)
    hc = h - mu
    var = jnp.sum(hc * hc, axis=-1, keepdims=True) * (1.0 / (n - 1))  # unbiased std
    std = jnp.sqrt(var)
    return w * (hc * _recip(std + 1e-5, approx)) + b


# ------------------------- kernel 1: LN1 + fused QKV -------------------------

def qkv_kernel(x_ref, ln1w_ref, ln1b_ref, wqkv_ref, bqkv_ref,
               q_ref, k_ref, v_ref, *, n_head, compute_dtype, approx_recip):
    x = x_ref[0]                                   # (tile_t, C) f32
    tile_t, C = x.shape
    hd = C // n_head

    h = _layernorm(x, ln1w_ref[...], ln1b_ref[...], approx_recip).astype(compute_dtype)

    # One fused (tile_t, C) @ (C, 3C) matmul; q-scale already folded into the weight.
    y = jnp.dot(h, wqkv_ref[...], preferred_element_type=jnp.float32) + bqkv_ref[...]
    y = y.astype(compute_dtype)

    def split_heads(z):                            # (tile_t, C) -> (n_head, tile_t, hd)
        return jnp.stack([z[:, i * hd:(i + 1) * hd] for i in range(n_head)], axis=0)

    # One wide store per output tensor (no per-head masked stores).
    q_ref[0] = split_heads(y[:, :C])
    k_ref[0] = split_heads(y[:, C:2 * C])
    v_ref[0] = split_heads(y[:, 2 * C:])


# --------------- kernel 2: flash attention + proj + LN2 + MLP ----------------

def attn_mlp_kernel(qi_ref, ki_ref,                 # scalar-prefetched schedule (SMEM)
                    x_ref, q_ref, k_ref, v_ref,
                    wp_ref, bp_ref, ln2w_ref, ln2b_ref,
                    w1_ref, b1_ref, w2_ref, b2_ref,
                    o_ref, m_sc, l_sc, acc_sc,
                    *, n_head, compute_dtype, approx_recip):
    s_idx = pl.program_id(1)
    qi = qi_ref[s_idx]
    ki = ki_ref[s_idx]
    tile_t = q_ref.shape[2]
    tile_k = k_ref.shape[2]

    @pl.when(ki == 0)                               # first kv tile of this q tile
    def _init():
        m_sc[...] = jnp.full_like(m_sc, _NEG_INF)
        l_sc[...] = jnp.zeros_like(l_sc)
        acc_sc[...] = jnp.zeros_like(acc_sc)

    def _scores():
        # q already carries the 1/sqrt(hd) scale (folded into the fused weight)
        return jnp.einsum('hqd,hkd->hqk', q_ref[0], k_ref[0],
                          preferred_element_type=jnp.float32)

    def _online_update(s):
        v = v_ref[0]
        m_prev = m_sc[...]
        m_new = jnp.maximum(m_prev, jnp.max(s, axis=-1, keepdims=True))
        alpha = jnp.exp(m_prev - m_new)
        p = jnp.exp(s - m_new)
        l_sc[...] = alpha * l_sc[...] + jnp.sum(p, axis=-1, keepdims=True)
        acc_sc[...] = alpha * acc_sc[...] + jnp.einsum(
            'hqk,hkd->hqd', p.astype(v.dtype), v, preferred_element_type=jnp.float32)
        m_sc[...] = m_new

    @pl.when(ki < qi)                               # interior tiles: no mask work at all
    def _interior():
        _online_update(_scores())

    @pl.when(ki == qi)                              # diagonal tile: mask + finalize
    def _diag_and_finalize():
        s = _scores()
        row = jax.lax.broadcasted_iota(jnp.int32, (tile_t, tile_k), 0)
        col = jax.lax.broadcasted_iota(jnp.int32, (tile_t, tile_k), 1)
        s = jnp.where((col <= row)[None, :, :], s, _NEG_INF)
        _online_update(s)

        inv_l = _recip(l_sc[...], approx_recip)
        y = acc_sc[...] * inv_l                     # (n_head, tile_t, hd) f32
        # merge heads into a lane-dense (tile_t, C) value (single wide value, no
        # per-head scratch stores), then run proj / residual / LN2 / MLP once.
        yc = jnp.concatenate([y[h] for h in range(n_head)], axis=-1).astype(compute_dtype)

        proj = jnp.dot(yc, wp_ref[...], preferred_element_type=jnp.float32) + bp_ref[...]
        x1 = x_ref[0] + proj                        # first residual (dropout p=0)

        h2 = _layernorm(x1, ln2w_ref[...], ln2b_ref[...], approx_recip).astype(compute_dtype)
        mlp = jnp.dot(h2, w1_ref[...], preferred_element_type=jnp.float32) + b1_ref[...]
        mlp = _gelu_exact(mlp, approx_recip).astype(compute_dtype)
        mlp = jnp.dot(mlp, w2_ref[...], preferred_element_type=jnp.float32) + b2_ref[...]

        o_ref[0] = (x1 + mlp).astype(o_ref.dtype)   # second residual (dropout p=0)


# ------------------------------- wrapper ------------------------------------

def _default_vmem_limit():
    # v5e/v6e have 128 MiB VMEM per core -> spend more of it on big tiles;
    # v7x has only 64 MiB -> keep headroom.  Unknown chips use the safe value.
    try:
        kind = jax.devices()[0].device_kind.lower()
    except Exception:
        kind = ""
    if any(t in kind for t in ("v5 lite", "v5e", "v5litepod", "v6", "trillium")):
        return 100 * 1024 * 1024
    return 48 * 1024 * 1024


def block_forward(x, params, n_head, *, tile_t=None,
                  compute_dtype=jnp.float32, approx_recip=True,
                  single_buffer_weights=True, vmem_limit_bytes=None):
    B, T, C = x.shape
    H = 4 * C
    assert C % n_head == 0
    hd = C // n_head

    if tile_t is None:
        tile_t = min(T, 128)   # TODO(synk): raise toward 256 on v6e/v7x when VMEM allows
    assert T % tile_t == 0 and (tile_t % 8 == 0 or tile_t == T)
    n_t = T // tile_t

    cd = jnp.dtype(compute_dtype)
    cd_bytes = cd.itemsize

    if vmem_limit_bytes is None:
        vmem_limit_bytes = _default_vmem_limit()

    # Fuse Wq/Wk/Wv into one (C, 3C) weight; fold the 1/sqrt(hd) query scale into
    # the Q slice of the fused weight & bias (once, in f32, on the host).
    scale = 1.0 / math.sqrt(hd)
    wqkv = jnp.concatenate(
        [params["wq"] * scale, params["wk"], params["wv"]], axis=1).astype(cd)
    bqkv = jnp.concatenate(
        [params["bq"] * scale, params["bk"], params["bv"]], axis=1)       # f32
    wp = params["wp"].astype(cd)
    w1 = params["w1"].astype(cd)
    w2 = params["w2"].astype(cd)
    bp, b1, b2 = params["bp"], params["b1"], params["b2"]
    ln1_w, ln1_b = params["ln1_w"], params["ln1_b"]
    ln2_w, ln2_b = params["ln2_w"], params["ln2_b"]

    # Grid-invariant weight blocks only need a single pipeline buffer.
    pm = dict(pipeline_mode=pl.Buffered(1)) if single_buffer_weights else {}

    # ---------------- kernel 1: LN1 + fused QKV ----------------
    def const1(shape):
        return pl.BlockSpec(shape, lambda b, t: (0,) * len(shape), **pm)

    qkv_in_specs = [
        pl.BlockSpec((1, tile_t, C), lambda b, t: (b, t, 0)),       # x
        const1((1, C)), const1((1, C)),                             # ln1 w, b
        const1((C, 3 * C)), const1((1, 3 * C)),                     # fused Wqkv, bqkv
    ]
    head_spec = pl.BlockSpec((1, n_head, tile_t, hd), lambda b, t: (b, 0, t, 0))

    k1_cost = pl.CostEstimate(
        flops=int(2 * B * T * C * 3 * C + 10 * B * T * C),
        transcendentals=0,
        bytes_accessed=int(B * T * C * 4 + 3 * C * C * cd_bytes + 8 * C * 4
                           + 3 * B * T * C * cd_bytes),
    )

    q, k, v = pl.pallas_call(
        functools.partial(qkv_kernel, n_head=n_head, compute_dtype=cd,
                          approx_recip=approx_recip),
        out_shape=[jax.ShapeDtypeStruct((B, n_head, T, hd), cd)] * 3,
        grid=(B, n_t),
        in_specs=qkv_in_specs,
        out_specs=[head_spec] * 3,
        compiler_params=pltpu.CompilerParams(
            dimension_semantics=("parallel", "parallel"),
            vmem_limit_bytes=vmem_limit_bytes),
        cost_estimate=k1_cost,
    )(x, ln1_w, ln1_b, wqkv, bqkv)

    # ------- kernel 2: flash attention + proj + residual + LN2 + MLP -------
    # Triangular schedule: only causal (ki <= qi) steps exist; the diagonal tile
    # (ki == qi) is the last kv step of its q-tile group.
    tri = [(qi, ki) for qi in range(n_t) for ki in range(qi + 1)]
    qi_arr = jnp.asarray([t[0] for t in tri], dtype=jnp.int32)
    ki_arr = jnp.asarray([t[1] for t in tri], dtype=jnp.int32)
    n_steps = len(tri)

    def const2(shape):
        return pl.BlockSpec(shape, lambda b, s, qi, ki: (0,) * len(shape), **pm)

    attn_in_specs = [
        pl.BlockSpec((1, tile_t, C), lambda b, s, qi, ki: (b, qi[s], 0)),            # x
        pl.BlockSpec((1, n_head, tile_t, hd), lambda b, s, qi, ki: (b, 0, qi[s], 0)),  # q
        pl.BlockSpec((1, n_head, tile_t, hd), lambda b, s, qi, ki: (b, 0, ki[s], 0)),  # k
        pl.BlockSpec((1, n_head, tile_t, hd), lambda b, s, qi, ki: (b, 0, ki[s], 0)),  # v
        const2((C, C)), const2((1, C)),                                              # Wproj, bproj
        const2((1, C)), const2((1, C)),                                              # ln2 w, b
        const2((C, H)), const2((1, H)),                                              # W1, b1
        const2((H, C)), const2((1, C)),                                              # W2, b2
    ]
    out_spec = pl.BlockSpec((1, tile_t, C), lambda b, s, qi, ki: (b, qi[s], 0))

    k2_cost = pl.CostEstimate(
        flops=int(B * (2 * T * T * C + 2 * T * C * C + 16 * T * C * C)),
        transcendentals=int(B * n_head * T * T // 2 + B * T * H),
        bytes_accessed=int(2 * B * T * C * 4 + B * T * C * cd_bytes * (1 + n_t)
                           + (2 * C * C + 2 * C * H) * cd_bytes + (5 * C + H) * 4),
    )

    grid_spec = pltpu.PrefetchScalarGridSpec(
        num_scalar_prefetch=2,
        grid=(B, n_steps),
        in_specs=attn_in_specs,
        out_specs=out_spec,
        scratch_shapes=[
            pltpu.VMEM((n_head, tile_t, 1), jnp.float32),   # running max  m
            pltpu.VMEM((n_head, tile_t, 1), jnp.float32),   # running sum  l
            pltpu.VMEM((n_head, tile_t, hd), jnp.float32),  # running acc
        ],
    )

    out = pl.pallas_call(
        functools.partial(attn_mlp_kernel, n_head=n_head, compute_dtype=cd,
                          approx_recip=approx_recip),
        out_shape=jax.ShapeDtypeStruct((B, T, C), jnp.float32),
        grid_spec=grid_spec,
        compiler_params=pltpu.CompilerParams(
            dimension_semantics=("parallel", "arbitrary"),
            vmem_limit_bytes=vmem_limit_bytes),
        cost_estimate=k2_cost,
    )(qi_arr, ki_arr, x, q, k, v, wp, bp, ln2_w, ln2_b, w1, b1, w2, b2)

    return out


# ----------------------------- parameter init -------------------------------

def init_params(key, n_embd):
    C, H = n_embd, 4 * n_embd
    ks = jax.random.split(key, 12)

    def linear(kw, kb, fan_in, fan_out):
        bound = 1.0 / math.sqrt(fan_in)
        w = jax.random.uniform(kw, (fan_in, fan_out), jnp.float32, -bound, bound)
        b = jax.random.uniform(kb, (1, fan_out), jnp.float32, -bound, bound)
        return w, b

    wq, bq = linear(ks[0], ks[1], C, C)
    wk, bk = linear(ks[2], ks[3], C, C)
    wv, bv = linear(ks[4], ks[5], C, C)
    wp, bp = linear(ks[6], ks[7], C, C)
    w1, b1 = linear(ks[8], ks[9], C, H)
    w2, b2 = linear(ks[10], ks[11], H, C)

    return dict(
        ln1_w=jnp.ones((1, C), jnp.float32), ln1_b=jnp.zeros((1, C), jnp.float32),
        wq=wq, bq=bq, wk=wk, bk=bk, wv=wv, bv=bv, wp=wp, bp=bp,
        ln2_w=jnp.ones((1, C), jnp.float32), ln2_b=jnp.zeros((1, C), jnp.float32),
        w1=w1, b1=b1, w2=w2, b2=b2,
    )


# ------------------------- pure-JAX reference check --------------------------

def block_reference(x, p, n_head):
    B, T, C = x.shape
    hd = C // n_head

    def ln(h, w, b):
        mu = h.mean(-1, keepdims=True)
        hc = h - mu
        std = jnp.sqrt(jnp.sum(hc * hc, -1, keepdims=True) / (C - 1))
        return w * (hc / (std + 1e-5)) + b

    h = ln(x, p["ln1_w"], p["ln1_b"])
    q = (h @ p["wq"] + p["bq"]).reshape(B, T, n_head, hd).transpose(0, 2, 1, 3)
    k = (h @ p["wk"] + p["bk"]).reshape(B, T, n_head, hd).transpose(0, 2, 1, 3)
    v = (h @ p["wv"] + p["bv"]).reshape(B, T, n_head, hd).transpose(0, 2, 1, 3)
    att = (q @ k.transpose(0, 1, 3, 2)) * (1.0 / math.sqrt(hd))
    mask = jnp.tril(jnp.ones((T, T)))
    att = jnp.where(mask == 0, -jnp.inf, att)
    att = jax.nn.softmax(att, axis=-1)
    y = (att @ v).transpose(0, 2, 1, 3).reshape(B, T, C)
    y = y @ p["wp"] + p["bp"]
    x1 = x + y
    h2 = ln(x1, p["ln2_w"], p["ln2_b"])
    m = jax.nn.gelu(h2 @ p["w1"] + p["b1"], approximate=False)
    m = m @ p["w2"] + p["b2"]
    return x1 + m


# ---------------------------------- main -------------------------------------

if __name__ == "__main__":
    B, T, C, n_head = 2, 8, 32, 4          # block_size >= T; dropout = 0.0 (eval)

    key = jax.random.PRNGKey(0)
    kx, kp = jax.random.split(key)
    x = jax.random.normal(kx, (B, T, C), jnp.float32)
    params = init_params(kp, C)
    ref = block_reference(x, params, n_head)

    # 1) exact-math f32 path (no approx reciprocal): tight tolerance.
    #    Try single-buffered invariant weights first; fall back to default double
    #    buffering if this JAX build does not support BlockSpec pipeline_mode.
    fwd = functools.partial(block_forward, single_buffer_weights=True)
    try:
        out = jax.block_until_ready(
            fwd(x, params, n_head, compute_dtype=jnp.float32, approx_recip=False))
    except Exception:
        fwd = functools.partial(block_forward, single_buffer_weights=False)
        out = jax.block_until_ready(
            fwd(x, params, n_head, compute_dtype=jnp.float32, approx_recip=False))
    np.testing.assert_allclose(np.asarray(out), np.asarray(ref), atol=2e-4, rtol=2e-4)

    # 2) performance path (approx EUP reciprocals), multi-tile triangular flash loop
    x2 = jax.random.normal(jax.random.PRNGKey(1), (B, 16, C), jnp.float32)
    ref2 = block_reference(x2, params, n_head)
    out2 = jax.block_until_ready(
        fwd(x2, params, n_head, tile_t=8,
            compute_dtype=jnp.float32, approx_recip=True))
    np.testing.assert_allclose(np.asarray(out2), np.asarray(ref2), atol=2e-2, rtol=2e-2)

    # 3) bf16 MXU-input path (f32 accumulation), multi-tile
    out3 = jax.block_until_ready(
        fwd(x2, params, n_head, tile_t=8,
            compute_dtype=jnp.bfloat16, approx_recip=True))
    np.testing.assert_allclose(np.asarray(out3), np.asarray(ref2), atol=1e-1, rtol=1e-1)

    print("KERNEL_OK")
</pallas_src>

<mosaic_0001>
module attributes {stable_mosaic.version = 11 : i64} {
  func.func @qkv_kernel(%arg0: i32, %arg1: i32, %arg2: memref<1x8x32xf32, #tpu.memory_space<vmem>>, %arg3: memref<1x32xf32, #tpu.memory_space<vmem>>, %arg4: memref<1x32xf32, #tpu.memory_space<vmem>>, %arg5: memref<32x96xf32, #tpu.memory_space<vmem>>, %arg6: memref<1x96xf32, #tpu.memory_space<vmem>>, %arg7: memref<1x4x8x8xf32, #tpu.memory_space<vmem>>, %arg8: memref<1x4x8x8xf32, #tpu.memory_space<vmem>>, %arg9: memref<1x4x8x8xf32, #tpu.memory_space<vmem>>) attributes {dimension_semantics = [#tpu.dimension_semantics<parallel>, #tpu.dimension_semantics<parallel>], iteration_bounds = array<i64: 2, 1>, scalar_prefetch = 0 : i64, scratch_operands = 0 : i64, tpu.core_type = #tpu.core_type<tc>, window_params = [{transform_indices = @transform_0, window_bounds = array<i64: 1, 8, 32>}, {pipeline_mode = #tpu.pipeline_mode<synchronous>, transform_indices = @transform_1, window_bounds = array<i64: 1, 32>}, {pipeline_mode = #tpu.pipeline_mode<synchronous>, transform_indices = @transform_2, window_bounds = array<i64: 1, 32>}, {pipeline_mode = #tpu.pipeline_mode<synchronous>, transform_indices = @transform_3, window_bounds = array<i64: 32, 96>}, {pipeline_mode = #tpu.pipeline_mode<synchronous>, transform_indices = @transform_4, window_bounds = array<i64: 1, 96>}, {transform_indices = @transform_5, window_bounds = array<i64: 1, 4, 8, 8>}, {transform_indices = @transform_6, window_bounds = array<i64: 1, 4, 8, 8>}, {transform_indices = @transform_7, window_bounds = array<i64: 1, 4, 8, 8>}]} {
    %c0 = arith.constant 0 : index
    %c0_0 = arith.constant 0 : index
    %c0_1 = arith.constant 0 : index
    %0 = vector.load %arg2[%c0, %c0_0, %c0_1] : memref<1x8x32xf32, #tpu.memory_space<vmem>>, vector<1x8x32xf32>
    %1 = vector.shape_cast %0 : vector<1x8x32xf32> to vector<8x32xf32>
    %c0_2 = arith.constant 0 : index
    %c0_3 = arith.constant 0 : index
    %2 = vector.load %arg3[%c0_2, %c0_3] : memref<1x32xf32, #tpu.memory_space<vmem>>, vector<1x32xf32>
    %c0_4 = arith.constant 0 : index
    %c0_5 = arith.constant 0 : index
    %3 = vector.load %arg4[%c0_4, %c0_5] : memref<1x32xf32, #tpu.memory_space<vmem>>, vector<1x32xf32>
    %cst = arith.constant dense<0.000000e+00> : vector<8xf32>
    %4 = vector.multi_reduction <add>, %1, %cst [1] : vector<8x32xf32> to vector<8xf32>
    %5 = vector.shape_cast %4 : vector<8xf32> to vector<8x1xf32>
    %cst_6 = arith.constant 3.200000e+01 : f32
    %6 = vector.broadcast %cst_6 : f32 to vector<8x1xf32>
    %7 = arith.divf %5, %6 : vector<8x1xf32>
    %8 = vector.broadcast %7 : vector<8x1xf32> to vector<8x32xf32>
    %9 = arith.subf %1, %8 : vector<8x32xf32>
    %10 = arith.mulf %9, %9 : vector<8x32xf32>
    %cst_7 = arith.constant dense<0.000000e+00> : vector<8xf32>
    %11 = vector.multi_reduction <add>, %10, %cst_7 [1] : vector<8x32xf32> to vector<8xf32>
    %12 = vector.shape_cast %11 : vector<8xf32> to vector<8x1xf32>
    %cst_8 = arith.constant 0.0322580636 : f32
    %13 = vector.broadcast %cst_8 : f32 to vector<8x1xf32>
    %14 = arith.mulf %12, %13 : vector<8x1xf32>
    %15 = math.sqrt %14 : vector<8x1xf32>
    %cst_9 = arith.constant 9.99999974E-6 : f32
    %16 = vector.broadcast %cst_9 : f32 to vector<8x1xf32>
    %17 = arith.addf %15, %16 : vector<8x1xf32>
    %18 = tpu.reciprocal %17 : vector<8x1xf32> -> vector<8x1xf32>
    %19 = vector.broadcast %18 : vector<8x1xf32> to vector<8x32xf32>
    %20 = arith.mulf %9, %19 : vector<8x32xf32>
    %21 = vector.broadcast %2 : vector<1x32xf32> to vector<8x32xf32>
    %22 = arith.mulf %21, %20 : vector<8x32xf32>
    %23 = vector.broadcast %3 : vector<1x32xf32> to vector<8x32xf32>
    %24 = arith.addf %22, %23 : vector<8x32xf32>
    %c0_10 = arith.constant 0 : index
    %c0_11 = arith.constant 0 : index
    %25 = vector.load %arg5[%c0_10, %c0_11] : memref<32x96xf32, #tpu.memory_space<vmem>>, vector<32x96xf32>
    %cst_12 = arith.constant dense<0.000000e+00> : vector<8x96xf32>
    %26 = tpu.matmul %24, %25, %cst_12 {dimension_numbers = #tpu.dot_dimension_numbers<[1], [0], [0], [1], [0, 0, 1, 1], [], []>} : vector<8x32xf32>, vector<32x96xf32>, vector<8x96xf32> -> vector<8x96xf32>
    %c0_13 = arith.constant 0 : index
    %c0_14 = arith.constant 0 : index
    %27 = vector.load %arg6[%c0_13, %c0_14] : memref<1x96xf32, #tpu.memory_space<vmem>>, vector<1x96xf32>
    %28 = vector.broadcast %27 : vector<1x96xf32> to vector<8x96xf32>
    %29 = arith.addf %26, %28 : vector<8x96xf32>
    %30 = vector.extract_strided_slice %29 {offsets = [0, 0], sizes = [8, 32], strides = [1, 1]} : vector<8x96xf32> to vector<8x32xf32>
    %31 = vector.extract_strided_slice %30 {offsets = [0, 0], sizes = [8, 8], strides = [1, 1]} : vector<8x32xf32> to vector<8x8xf32>
    %32 = vector.extract_strided_slice %30 {offsets = [0, 8], sizes = [8, 8], strides = [1, 1]} : vector<8x32xf32> to vector<8x8xf32>
    %33 = vector.extract_strided_slice %30 {offsets = [0, 16], sizes = [8, 8], strides = [1, 1]} : vector<8x32xf32> to vector<8x8xf32>
    %34 = vector.extract_strided_slice %30 {offsets = [0, 24], sizes = [8, 8], strides = [1, 1]} : vector<8x32xf32> to vector<8x8xf32>
    %35 = vector.shape_cast %31 : vector<8x8xf32> to vector<1x8x8xf32>
    %36 = vector.shape_cast %32 : vector<8x8xf32> to vector<1x8x8xf32>
    %37 = vector.shape_cast %33 : vector<8x8xf32> to vector<1x8x8xf32>
    %38 = vector.shape_cast %34 : vector<8x8xf32> to vector<1x8x8xf32>
    %39 = tpu.concatenate %35, %36, %37, %38 in 0 : vector<1x8x8xf32>, vector<1x8x8xf32>, vector<1x8x8xf32>, vector<1x8x8xf32> -> vector<4x8x8xf32>
    %c0_15 = arith.constant 0 : index
    %c0_16 = arith.constant 0 : index
    %c0_17 = arith.constant 0 : index
    %c0_18 = arith.constant 0 : index
    %40 = vector.load %arg7[%c0_15, %c0_16, %c0_17, %c0_18] : memref<1x4x8x8xf32, #tpu.memory_space<vmem>>, vector<1x4x8x8xf32>
    %41 = vector.shape_cast %40 : vector<1x4x8x8xf32> to vector<4x8x8xf32>
    %42 = vector.shape_cast %39 : vector<4x8x8xf32> to vector<1x4x8x8xf32>
    tpu.vector_store %arg7[%c0_15, %c0_16, %c0_17, %c0_18], %42 {strides = array<i32>} : memref<1x4x8x8xf32, #tpu.memory_space<vmem>>, vector<1x4x8x8xf32>,
    %43 = vector.extract_strided_slice %29 {offsets = [0, 32], sizes = [8, 32], strides = [1, 1]} : vector<8x96xf32> to vector<8x32xf32>
    %44 = vector.extract_strided_slice %43 {offsets = [0, 0], sizes = [8, 8], strides = [1, 1]} : vector<8x32xf32> to vector<8x8xf32>
    %45 = vector.extract_strided_slice %43 {offsets = [0, 8], sizes = [8, 8], strides = [1, 1]} : vector<8x32xf32> to vector<8x8xf32>
    %46 = vector.extract_strided_slice %43 {offsets = [0, 16], sizes = [8, 8], strides = [1, 1]} : vector<8x32xf32> to vector<8x8xf32>
    %47 = vector.extract_strided_slice %43 {offsets = [0, 24], sizes = [8, 8], strides = [1, 1]} : vector<8x32xf32> to vector<8x8xf32>
    %48 = vector.shape_cast %44 : vector<8x8xf32> to vector<1x8x8xf32>
    %49 = vector.shape_cast %45 : vector<8x8xf32> to vector<1x8x8xf32>
    %50 = vector.shape_cast %46 : vector<8x8xf32> to vector<1x8x8xf32>
    %51 = vector.shape_cast %47 : vector<8x8xf32> to vector<1x8x8xf32>
    %52 = tpu.concatenate %48, %49, %50, %51 in 0 : vector<1x8x8xf32>, vector<1x8x8xf32>, vector<1x8x8xf32>, vector<1x8x8xf32> -> vector<4x8x8xf32>
    %c0_19 = arith.constant 0 : index
    %c0_20 = arith.constant 0 : index
    %c0_21 = arith.constant 0 : index
    %c0_22 = arith.constant 0 : index
    %53 = vector.load %arg8[%c0_19, %c0_20, %c0_21, %c0_22] : memref<1x4x8x8xf32, #tpu.memory_space<vmem>>, vector<1x4x8x8xf32>
    %54 = vector.shape_cast %53 : vector<1x4x8x8xf32> to vector<4x8x8xf32>
    %55 = vector.shape_cast %52 : vector<4x8x8xf32> to vector<1x4x8x8xf32>
    tpu.vector_store %arg8[%c0_19, %c0_20, %c0_21, %c0_22], %55 {strides = array<i32>} : memref<1x4x8x8xf32, #tpu.memory_space<vmem>>, vector<1x4x8x8xf32>,
    %56 = vector.extract_strided_slice %29 {offsets = [0, 64], sizes = [8, 32], strides = [1, 1]} : vector<8x96xf32> to vector<8x32xf32>
    %57 = vector.extract_strided_slice %56 {offsets = [0, 0], sizes = [8, 8], strides = [1, 1]} : vector<8x32xf32> to vector<8x8xf32>
    %58 = vector.extract_strided_slice %56 {offsets = [0, 8], sizes = [8, 8], strides = [1, 1]} : vector<8x32xf32> to vector<8x8xf32>
    %59 = vector.extract_strided_slice %56 {offsets = [0, 16], sizes = [8, 8], strides = [1, 1]} : vector<8x32xf32> to vector<8x8xf32>
    %60 = vector.extract_strided_slice %56 {offsets = [0, 24], sizes = [8, 8], strides = [1, 1]} : vector<8x32xf32> to vector<8x8xf32>
    %61 = vector.shape_cast %57 : vector<8x8xf32> to vector<1x8x8xf32>
    %62 = vector.shape_cast %58 : vector<8x8xf32> to vector<1x8x8xf32>
    %63 = vector.shape_cast %59 : vector<8x8xf32> to vector<1x8x8xf32>
    %64 = vector.shape_cast %60 : vector<8x8xf32> to vector<1x8x8xf32>
    %65 = tpu.concatenate %61, %62, %63, %64 in 0 : vector<1x8x8xf32>, vector<1x8x8xf32>, vector<1x8x8xf32>, vector<1x8x8xf32> -> vector<4x8x8xf32>
    %c0_23 = arith.constant 0 : index
    %c0_24 = arith.constant 0 : index
    %c0_25 = arith.constant 0 : index
    %c0_26 = arith.constant 0 : index
    %66 = vector.load %arg9[%c0_23, %c0_24, %c0_25, %c0_26] : memref<1x4x8x8xf32, #tpu.memory_space<vmem>>, vector<1x4x8x8xf32>
    %67 = vector.shape_cast %66 : vector<1x4x8x8xf32> to vector<4x8x8xf32>
    %68 = vector.shape_cast %65 : vector<4x8x8xf32> to vector<1x4x8x8xf32>
    tpu.vector_store %arg9[%c0_23, %c0_24, %c0_25, %c0_26], %68 {strides = array<i32>} : memref<1x4x8x8xf32, #tpu.memory_space<vmem>>, vector<1x4x8x8xf32>,
    return
  }
  func.func @transform_0(%arg0: i32, %arg1: i32) -> (i32, i32, i32) {
    %c0_i32 = arith.constant 0 : i32
    %c0_i32_0 = arith.constant 0 : i32
    return %arg0, %arg1, %c0_i32 : i32, i32, i32
  }
  func.func @transform_1(%arg0: i32, %arg1: i32) -> (i32, i32) {
    %c0_i32 = arith.constant 0 : i32
    %c0_i32_0 = arith.constant 0 : i32
    %c0_i32_1 = arith.constant 0 : i32
    return %c0_i32, %c0_i32_0 : i32, i32
  }
  func.func @transform_2(%arg0: i32, %arg1: i32) -> (i32, i32) {
    %c0_i32 = arith.constant 0 : i32
    %c0_i32_0 = arith.constant 0 : i32
    %c0_i32_1 = arith.constant 0 : i32
    return %c0_i32, %c0_i32_0 : i32, i32
  }
  func.func @transform_3(%arg0: i32, %arg1: i32) -> (i32, i32) {
    %c0_i32 = arith.constant 0 : i32
    %c0_i32_0 = arith.constant 0 : i32
    %c0_i32_1 = arith.constant 0 : i32
    return %c0_i32, %c0_i32_0 : i32, i32
  }
  func.func @transform_4(%arg0: i32, %arg1: i32) -> (i32, i32) {
    %c0_i32 = arith.constant 0 : i32
    %c0_i32_0 = arith.constant 0 : i32
    %c0_i32_1 = arith.constant 0 : i32
    return %c0_i32, %c0_i32_0 : i32, i32
  }
  func.func @transform_5(%arg0: i32, %arg1: i32) -> (i32, i32, i32, i32) {
    %c0_i32 = arith.constant 0 : i32
    %c0_i32_0 = arith.constant 0 : i32
    %c0_i32_1 = arith.constant 0 : i32
    return %arg0, %c0_i32, %arg1, %c0_i32_0 : i32, i32, i32, i32
  }
  func.func @transform_6(%arg0: i32, %arg1: i32) -> (i32, i32, i32, i32) {
    %c0_i32 = arith.constant 0 : i32
    %c0_i32_0 = arith.constant 0 : i32
    %c0_i32_1 = arith.constant 0 : i32
    return %arg0, %c0_i32, %arg1, %c0_i32_0 : i32, i32, i32, i32
  }
  func.func @transform_7(%arg0: i32, %arg1: i32) -> (i32, i32, i32, i32) {
    %c0_i32 = arith.constant 0 : i32
    %c0_i32_0 = arith.constant 0 : i32
    %c0_i32_1 = arith.constant 0 : i32
    return %arg0, %c0_i32, %arg1, %c0_i32_0 : i32, i32, i32, i32
  }
}

module attributes {stable_mosaic.version = 11 : i64} {
  func.func @qkv_kernel(%arg0: i32, %arg1: i32, %arg2: memref<1x8x32xf32, #tpu.memory_space<vmem>>, %arg3: memref<1x32xf32, #tpu.memory_space<vmem>>, %arg4: memref<1x32xf32, #tpu.memory_space<vmem>>, %arg5: memref<32x96xf32, #tpu.memory_space<vmem>>, %arg6: memref<1x96xf32, #tpu.memory_space<vmem>>, %arg7: memref<1x4x8x8xf32, #tpu.memory_space<vmem>>, %arg8: memref<1x4x8x8xf32, #tpu.memory_space<vmem>>, %arg9: memref<1x4x8x8xf32, #tpu.memory_space<vmem>>) attributes {dimension_semantics = [#tpu.dimension_semantics<parallel>, #tpu.dimension_semantics<parallel>], iteration_bounds = array<i64: 2, 1>, scalar_prefetch = 0 : i64, scratch_operands = 0 : i64, tpu.core_type = #tpu.core_type<tc>, window_params = [{transform_indices = @transform_0, window_bounds = array<i64: 1, 8, 32>}, {pipeline_mode = #tpu.pipeline_mode<synchronous>, transform_indices = @transform_1, window_bounds = array<i64: 1, 32>}, {pipeline_mode = #tpu.pipeline_mode<synchronous>, transform_indices = @transform_2, window_bounds = array<i64: 1, 32>}, {pipeline_mode = #tpu.pipeline_mode<synchronous>, transform_indices = @transform_3, window_bounds = array<i64: 32, 96>}, {pipeline_mode = #tpu.pipeline_mode<synchronous>, transform_indices = @transform_4, window_bounds = array<i64: 1, 96>}, {transform_indices = @transform_5, window_bounds = array<i64: 1, 4, 8, 8>}, {transform_indices = @transform_6, window_bounds = array<i64: 1, 4, 8, 8>}, {transform_indices = @transform_7, window_bounds = array<i64: 1, 4, 8, 8>}]} {
    %c0 = arith.constant 0 : index
    %c0_0 = arith.constant 0 : index
    %c0_1 = arith.constant 0 : index
    %0 = vector.load %arg2[%c0, %c0_0, %c0_1] : memref<1x8x32xf32, #tpu.memory_space<vmem>>, vector<1x8x32xf32>
    %1 = vector.shape_cast %0 : vector<1x8x32xf32> to vector<8x32xf32>
    %c0_2 = arith.constant 0 : index
    %c0_3 = arith.constant 0 : index
    %2 = vector.load %arg3[%c0_2, %c0_3] : memref<1x32xf32, #tpu.memory_space<vmem>>, vector<1x32xf32>
    %c0_4 = arith.constant 0 : index
    %c0_5 = arith.constant 0 : index
    %3 = vector.load %arg4[%c0_4, %c0_5] : memref<1x32xf32, #tpu.memory_space<vmem>>, vector<1x32xf32>
    %cst = arith.constant dense<0.000000e+00> : vector<8xf32>
    %4 = vector.multi_reduction <add>, %1, %cst [1] : vector<8x32xf32> to vector<8xf32>
    %5 = vector.shape_cast %4 : vector<8xf32> to vector<8x1xf32>
    %cst_6 = arith.constant 3.200000e+01 : f32
    %6 = vector.broadcast %cst_6 : f32 to vector<8x1xf32>
    %7 = arith.divf %5, %6 : vector<8x1xf32>
    %8 = vector.broadcast %7 : vector<8x1xf32> to vector<8x32xf32>
    %9 = arith.subf %1, %8 : vector<8x32xf32>
    %10 = arith.mulf %9, %9 : vector<8x32xf32>
    %cst_7 = arith.constant dense<0.000000e+00> : vector<8xf32>
    %11 = vector.multi_reduction <add>, %10, %cst_7 [1] : vector<8x32xf32> to vector<8xf32>
    %12 = vector.shape_cast %11 : vector<8xf32> to vector<8x1xf32>
    %cst_8 = arith.constant 0.0322580636 : f32
    %13 = vector.broadcast %cst_8 : f32 to vector<8x1xf32>
    %14 = arith.mulf %12, %13 : vector<8x1xf32>
    %15 = math.sqrt %14 : vector<8x1xf32>
    %cst_9 = arith.constant 9.99999974E-6 : f32
    %16 = vector.broadcast %cst_9 : f32 to vector<8x1xf32>
    %17 = arith.addf %15, %16 : vector<8x1xf32>
    %18 = tpu.reciprocal %17 : vector<8x1xf32> -> vector<8x1xf32>
    %19 = vector.broadcast %18 : vector<8x1xf32> to vector<8x32xf32>
    %20 = arith.mulf %9, %19 : vector<8x32xf32>
    %21 = vector.broadcast %2 : vector<1x32xf32> to vector<8x32xf32>
    %22 = arith.mulf %21, %20 : vector<8x32xf32>
    %23 = vector.broadcast %3 : vector<1x32xf32> to vector<8x32xf32>
    %24 = arith.addf %22, %23 : vector<8x32xf32>
    %c0_10 = arith.constant 0 : index
    %c0_11 = arith.constant 0 : index
    %25 = vector.load %arg5[%c0_10, %c0_11] : memref<32x96xf32, #tpu.memory_space<vmem>>, vector<32x96xf32>
    %cst_12 = arith.constant dense<0.000000e+00> : vector<8x96xf32>
    %26 = tpu.matmul %24, %25, %cst_12 {dimension_numbers = #tpu.dot_dimension_numbers<[1], [0], [0], [1], [0, 0, 1, 1], [], []>} : vector<8x32xf32>, vector<32x96xf32>, vector<8x96xf32> -> vector<8x96xf32>
    %c0_13 = arith.constant 0 : index
    %c0_14 = arith.constant 0 : index
    %27 = vector.load %arg6[%c0_13, %c0_14] : memref<1x96xf32, #tpu.memory_space<vmem>>, vector<1x96xf32>
    %28 = vector.broadcast %27 : vector<1x96xf32> to vector<8x96xf32>
    %29 = arith.addf %26, %28 : vector<8x96xf32>
    %30 = vector.extract_strided_slice %29 {offsets = [0, 0], sizes = [8, 32], strides = [1, 1]} : vector<8x96xf32> to vector<8x32xf32>
    %31 = vector.extract_strided_slice %30 {offsets = [0, 0], sizes = [8, 8], strides = [1, 1]} : vector<8x32xf32> to vector<8x8xf32>
    %32 = vector.extract_strided_slice %30 {offsets = [0, 8], sizes = [8, 8], strides = [1, 1]} : vector<8x32xf32> to vector<8x8xf32>
    %33 = vector.extract_strided_slice %30 {offsets = [0, 16], sizes = [8, 8], strides = [1, 1]} : vector<8x32xf32> to vector<8x8xf32>
    %34 = vector.extract_strided_slice %30 {offsets = [0, 24], sizes = [8, 8], strides = [1, 1]} : vector<8x32xf32> to vector<8x8xf32>
    %35 = vector.shape_cast %31 : vector<8x8xf32> to vector<1x8x8xf32>
    %36 = vector.shape_cast %32 : vector<8x8xf32> to vector<1x8x8xf32>
    %37 = vector.shape_cast %33 : vector<8x8xf32> to vector<1x8x8xf32>
    %38 = vector.shape_cast %34 : vector<8x8xf32> to vector<1x8x8xf32>
    %39 = tpu.concatenate %35, %36, %37, %38 in 0 : vector<1x8x8xf32>, vector<1x8x8xf32>, vector<1x8x8xf32>, vector<1x8x8xf32> -> vector<4x8x8xf32>
    %c0_15 = arith.constant 0 : index
    %c0_16 = arith.constant 0 : index
    %c0_17 = arith.constant 0 : index
    %c0_18 = arith.constant 0 : index
    %40 = vector.load %arg7[%c0_15, %c0_16, %c0_17, %c0_18] : memref<1x4x8x8xf32, #tpu.memory_space<vmem>>, vector<1x4x8x8xf32>
    %41 = vector.shape_cast %40 : vector<1x4x8x8xf32> to vector<4x8x8xf32>
    %42 = vector.shape_cast %39 : vector<4x8x8xf32> to vector<1x4x8x8xf32>
    tpu.vector_store %arg7[%c0_15, %c0_16, %c0_17, %c0_18], %42 {strides = array<i32>} : memref<1x4x8x8xf32, #tpu.memory_space<vmem>>, vector<1x4x8x8xf32>,
    %43 = vector.extract_strided_slice %29 {offsets = [0, 32], sizes = [8, 32], strides = [1, 1]} : vector<8x96xf32> to vector<8x32xf32>
    %44 = vector.extract_strided_slice %43 {offsets = [0, 0], sizes = [8, 8], strides = [1, 1]} : vector<8x32xf32> to vector<8x8xf32>
    %45 = vector.extract_strided_slice %43 {offsets = [0, 8], sizes = [8, 8], strides = [1, 1]} : vector<8x32xf32> to vector<8x8xf32>
    %46 = vector.extract_strided_slice %43 {offsets = [0, 16], sizes = [8, 8], strides = [1, 1]} : vector<8x32xf32> to vector<8x8xf32>
    %47 = vector.extract_strided_slice %43 {offsets = [0, 24], sizes = [8, 8], strides = [1, 1]} : vector<8x32xf32> to vector<8x8xf32>
    %48 = vector.shape_cast %44 : vector<8x8xf32> to vector<1x8x8xf32>
    %49 = vector.shape_cast %45 : vector<8x8xf32> to vector<1x8x8xf32>
    %50 = vector.shape_cast %46 : vector<8x8xf32> to vector<1x8x8xf32>
    %51 = vector.shape_cast %47 : vector<8x8xf32> to vector<1x8x8xf32>
    %52 = tpu.concatenate %48, %49, %50, %51 in 0 : vector<1x8x8xf32>, vector<1x8x8xf32>, vector<1x8x8xf32>, vector<1x8x8xf32> -> vector<4x8x8xf32>
    %c0_19 = arith.constant 0 : index
    %c0_20 = arith.constant 0 : index
    %c0_21 = arith.constant 0 : index
    %c0_22 = arith.constant 0 : index
    %53 = vector.load %arg8[%c0_19, %c0_20, %c0_21, %c0_22] : memref<1x4x8x8xf32, #tpu.memory_space<vmem>>, vector<1x4x8x8xf32>
    %54 = vector.shape_cast %53 : vector<1x4x8x8xf32> to vector<4x8x8xf32>
    %55 = vector.shape_cast %52 : vector<4x8x8xf32> to vector<1x4x8x8xf32>
    tpu.vector_store %arg8[%c0_19, %c0_20, %c0_21, %c0_22], %55 {strides = array<i32>} : memref<1x4x8x8xf32, #tpu.memory_space<vmem>>, vector<1x4x8x8xf32>,
    %56 = vector.extract_strided_slice %29 {offsets = [0, 64], sizes = [8, 32], strides = [1, 1]} : vector<8x96xf32> to vector<8x32xf32>
    %57 = vector.extract_strided_slice %56 {offsets = [0, 0], sizes = [8, 8], strides = [1, 1]} : vector<8x32xf32> to vector<8x8xf32>
    %58 = vector.extract_strided_slice %56 {offsets = [0, 8], sizes = [8, 8], strides = [1, 1]} : vector<8x32xf32> to vector<8x8xf32>
    %59 = vector.extract_strided_slice %56 {offsets = [0, 16], sizes = [8, 8], strides = [1, 1]} : vector<8x32xf32> to vector<8x8xf32>
    %60 = vector.extract_strided_slice %56 {offsets = [0, 24], sizes = [8, 8], strides = [1, 1]} : vector<8x32xf32> to vector<8x8xf32>
    %61 = vector.shape_cast %57 : vector<8x8xf32> to vector<1x8x8xf32>
    %62 = vector.shape_cast %58 : vector<8x8xf32> to vector<1x8x8xf32>
    %63 = vector.shape_cast %59 : vector<8x8xf32> to vector<1x8x8xf32>
    %64 = vector.shape_cast %60 : vector<8x8xf32> to vector<1x8x8xf32>
    %65 = tpu.concatenate %61, %62, %63, %64 in 0 : vector<1x8x8xf32>, vector<1x8x8xf32>, vector<1x8x8xf32>, vector<1x8x8xf32> -> vector<4x8x8xf32>
    %c0_23 = arith.constant 0 : index
    %c0_24 = arith.constant 0 : index
    %c0_25 = arith.constant 0 : index
    %c0_26 = arith.constant 0 : index
    %66 = vector.load %arg9[%c0_23, %c0_24, %c0_25, %c0_26] : memref<1x4x8x8xf32, #tpu.memory_space<vmem>>, vector<1x4x8x8xf32>
    %67 = vector.shape_cast %66 : vector<1x4x8x8xf32> to vector<4x8x8xf32>
    %68 = vector.shape_cast %65 : vector<4x8x8xf32> to vector<1x4x8x8xf32>
    tpu.vector_store %arg9[%c0_23, %c0_24, %c0_25, %c0_26], %68 {strides = array<i32>} : memref<1x4x8x8xf32, #tpu.memory_space<vmem>>, vector<1x4x8x8xf32>,
    return
  }
  func.func @transform_0(%arg0: i32, %arg1: i32) -> (i32, i32, i32) {
    %c0_i32 = arith.constant 0 : i32
    %c0_i32_0 = arith.constant 0 : i32
    return %arg0, %arg1, %c0_i32 : i32, i32, i32
  }
  func.func @transform_1(%arg0: i32, %arg1: i32) -> (i32, i32) {
    %c0_i32 = arith.constant 0 : i32
    %c0_i32_0 = arith.constant 0 : i32
    %c0_i32_1 = arith.constant 0 : i32
    return %c0_i32, %c0_i32_0 : i32, i32
  }
  func.func @transform_2(%arg0: i32, %arg1: i32) -> (i32, i32) {
    %c0_i32 = arith.constant 0 : i32
    %c0_i32_0 = arith.constant 0 : i32
    %c0_i32_1 = arith.constant 0 : i32
    return %c0_i32, %c0_i32_0 : i32, i32
  }
  func.func @transform_3(%arg0: i32, %arg1: i32) -> (i32, i32) {
    %c0_i32 = arith.constant 0 : i32
    %c0_i32_0 = arith.constant 0 : i32
    %c0_i32_1 = arith.constant 0 : i32
    return %c0_i32, %c0_i32_0 : i32, i32
  }
  func.func @transform_4(%arg0: i32, %arg1: i32) -> (i32, i32) {
    %c0_i32 = arith.constant 0 : i32
    %c0_i32_0 = arith.constant 0 : i32
    %c0_i32_1 = arith.constant 0 : i32
    return %c0_i32, %c0_i32_0 : i32, i32
  }
  func.func @transform_5(%arg0: i32, %arg1: i32) -> (i32, i32, i32, i32) {
    %c0_i32 = arith.constant 0 : i32
    %c0_i32_0 = arith.constant 0 : i32
    %c0_i32_1 = arith.constant 0 : i32
    return %arg0, %c0_i32, %arg1, %c0_i32_0 : i32, i32, i32, i32
  }
  func.func @transform_6(%arg0: i32, %arg1: i32) -> (i32, i32, i32, i32) {
    %c0_i32 = arith.constant 0 : i32
    %c0_i32_0 = arith.constant 0 : i32
    %c0_i32_1 = arith.constant 0 : i32
    return %arg0, %c0_i32, %arg1, %c0_i32_0 : i32, i32, i32, i32
  }
  func.func @transform_7(%arg0: i32, %arg1: i32) -> (i32, i32, i32, i32) {
    %c0_i32 = arith.constant 0 : i32
    %c0_i32_0 = arith.constant 0 : i32
    %c0_i32_1 = arith.constant 0 : i32
    return %arg0, %c0_i32, %arg1, %c0_i32_0 : i32, i32, i32, i32
  }
}

</mosaic_0001>

<bundles_post_ra>
// kernel: tpu_custom_call.1
= control target key start
LH: loop header
LB: loop body
LE: loop exit
PB: predicated region body
PF: predicated region fallthrough
CT: control target
= control target key end

     0   :  { %s1487_s0 = inlined_call_operand.hbm [shape: f32[2,8,32], index: 0, kind: input, shape index: {}]   ;;  %s1488_s1 = inlined_call_operand.vmem [shape: f32[1,32], index: 1, kind: input, shape index: {}]   ;;  %s1489_s2 = inlined_call_operand.vmem [shape: f32[1,32], index: 2, kind: input, shape index: {}]   ;;  %s1490_s3 = inlined_call_operand.hbm [shape: f32[32,96], index: 3, kind: input, shape index: {}]   ;;  %s1491_s4 = inlined_call_operand.vmem [shape: f32[1,96], index: 4, kind: input, shape index: {}]   ;;  %s1492_s5 = inlined_call_operand.hbm [shape: f32[2,4,8,8], index: 5, kind: output, shape index: {0}]   ;;  %s1493_s6 = inlined_call_operand.hbm [shape: f32[2,4,8,8], index: 6, kind: output, shape index: {1}]   ;;  %s1494_s7 = inlined_call_operand.hbm [shape: f32[2,4,8,8], index: 7, kind: output, shape index: {2}]  }
   0x1   :  { %1502 = sst [smem:[#allocation16_spill]] %s1490_s3 }
   0x2   :  { %13 = vsyncpa [#allocation3], 0 }
   0x3   :  { %15 = vsyncpa [#allocation3 + $0x1], 0 }
   0x4   :  { %16 = vsyncpa [#allocation6], 0 }
   0x5   :  { %17 = vsyncpa [#allocation4], 0 }
   0x6   :  { %19 = vsyncpa [#allocation4 + $0x1], 0 }
   0x7   :  { %20 = vsyncpa [#allocation9], 0 }
   0x8   :  { %22 = vsyncpa [#allocation9 + $0x1], 0  ;;  %s1151_s24 = smov 0   ;;  %s1153_s25 = smov 0  }
   0x9   :  { %s1155_s26 = smov 0   ;;  %s1157_s27 = smov 0  }
   0xa   :  { %s1159_s28 = smov 0   ;;  %s1161_s29 = smov 0  }
   0xb LB: > { %s1182_s30 = sadd.s32 4294967295, %s1092_s29   ;;  %s1498_s8 = sadd.s32 4294967294, %s1092_s29   ;;  %s1092_s29 = sphi %s1161_s29, %s28_s29   ;;  %s1088_s28 = sphi %s1159_s28, %s1526_s28   ;;  %s1084_s27 = sphi %s1157_s27, %s1525_s27   ;;  %s1080_s26 = sphi %s1155_s26, %s1524_s26   ;;  %s1076_s25 = sphi %s1153_s25, %s1523_s25   ;;  %s1072_s24 = sphi %s1151_s24, %s1522_s24  }
   0xc   : > { %p62_p0 = scmp.ne.s32.totalorder %s1076_s25, %s1072_s24  ;;  %p1495_p1 = scmp.eq.s32.totalorder %s1182_s30, 0 }
   0xd   : > { %p178_p3 = scmp.eq.s32.totalorder %s1498_s8, 1  ;;  %p738_p5 = scmp.ge.s32.totalorder %s1092_s29, 1 }
   0xe   : > { %p1193_p4 = por %p1495_p1, %p62_p0  ;;  %p241_p7 = scmp.lt.s32.totalorder %s1092_s29, 3 }
   0xf   : > { %p1198_p6 = por %p178_p3, %p62_p0  ;;  %s1094_s12 = smov [#allocation5]  }
  0x10   : > { %s1503_s9 = scalar_select %p1193_p4, 1, 0 }
  0x11   : > { %s1504_s10 = scalar_select %p1198_p6, 1, 0 }
  0x12   : > { %p1203_p8 = pnand %p738_p5, %p241_p7  ;;  %s259_s13 = sshll.u32 %s1094_s12, 4  ;;  %s260_s13 = int_to_ptr.vmem [resolvable:$true] %s259_s13 }
  0x13   : > { %s40_s15 = sadd.s32 1, %s1088_s28  ;;  %s1507_s3 = sld [smem:[#allocation16_spill]] }
  0x14   : > { %s1505_s11 = scalar_select %p1203_p8, 1, 0 }
  0x15   : > { %p801_p9 = pneg %p1203_p8 }
  0x17   : > { %p1212_p11 = pnand %p801_p9, %p1495_p1 }
  0x19   : > { %s888_s18 = scalar_lea.hbm %s1507_s3, 512  ;;  %p890_p13 = pneg %p1212_p11 }
  0x1a   : > { %p889_p12 = scmp.ne.s32.totalorder %s1507_s3, %s888_s18  ;;  %p895_p5 = scmp.lt.u32.totalorder %s888_s18, %s1507_s3 }
  0x1c   : > { %p891_p0 = pnand %p890_p13, %p889_p12 }
  0x1e   : > { %p892_p3 = pneg %p891_p0 }
  0x20   : > { %p897_p7 = pnand %p895_p5, %p892_p3 }
  0x22   : > { %900 = shalt.err (!%p897_p7)
}
  0x23   : > { %s901_s23 = scalar_lea.vmem %s260_s13, 512  ;;  %p909_p2 = scmp.lt.s32.totalorder %s260_s13, %s260_s13 }
  0x24   : > { %p902_p9 = scmp.ne.s32.totalorder %s260_s13, %s901_s23  ;;  %p910_p6 = scmp.lt.s32.totalorder %s901_s23, %s901_s23 }
  0x26   : > { %p904_p10 = pnand %p902_p9, %p890_p13  ;;  %p911_p4 = por %p910_p6, %p909_p2 }
  0x28   : > { %p905_p1 = pneg %p904_p10 }
  0x2a   : > { %p912_p8 = pnand %p911_p4, %p905_p1 }
  0x2c   : > { %915 = shalt.err (!%p912_p8)
}
  0x2d   : > { %s1095_s12 = smov 128   ;;  %s1096_s16 = smov 8  }
  0x2e   : > { %804 = dma.hbm_to_vmem [thread:$0]  (!%p1212_p11), %s1507_s3, 512, %s260_s13, [#allocation6], %s1095_s12, %s1095_s12, %s1096_s16  }
  0x2f   : > { %p42_p1 = scmp.ge.s32.totalorder %s40_s15, 2  ;;  %s49_s19 = sadd.s32 1, %s1080_s26 }
  0x30   : > { %p56_p2 = scmp.ne.s32.totalorder %s1080_s26, %s1076_s25  ;;  %p57_p4 = scmp.eq.s32.totalorder %s1092_s29, 0 }
  0x31   : > { %s1528_s15 = smov (%p42_p1, %s40_s15), 0  ;;  %p1510_p8 = scmp.eq.s32.totalorder %s1182_s30, 1 }
  0x32   : > { %1508 = sst [smem:[#allocation15_spill]] %s1528_s15  ;;  %p1239_p6 = por %p57_p4, %p56_p2 }
  0x33   : > { %p1245_p10 = por %p1510_p8, %p56_p2  ;;  %s44_s14 = ssub.s32 %s1088_s28, %s1528_s15 }
  0x34   : > { %p820_p12 = scmp.lt.s32.totalorder %s1092_s29, 2  ;;  %p47_p11 = scmp.eq.s32.totalorder %s44_s14, 0 }
  0x35   : > { %s276_s13 = sand.u32 1, %s1080_s26   ;;  %s742_s12 = sshll.u32 %s1088_s28, 7 }
  0x36   : > { %s741_s22 = sshll.u32 %s276_s13, 3  ;;  %s1260_s18 = scalar_lea.hbm %s1487_s0, %s742_s12 }
  0x37   : > { %s1254_s23 = scalar_select %p47_p11, %s1080_s26, %s49_s19  }
  0x38   : > { %s280_s8 = scalar_lea.vmem [#allocation2], %s741_s22  ;;  %p1266_p13 = pnand %p820_p12, %p1239_p6 }
  0x39   : > { %s288_s3 = sshll.u32 %s280_s8, 4  ;;  %s277_s19 = scalar_lea.sflag [#allocation3], %s276_s13  ;;  %s1262_s3 = int_to_ptr.vmem [resolvable:$true] %s288_s3 }
  0x3a   : > { %s916_s15 = scalar_lea.hbm %s1260_s18, 128  ;;  %p918_p3 = pneg %p1266_p13 }
  0x3b   : > { %p917_p0 = scmp.ne.s32.totalorder %s1260_s18, %s916_s15  ;;  %s921_s12 = scalar_lea.hbm %s1487_s0, 256 }
  0x3c   : > { %p922_p9 = scmp.lt.u32.totalorder %s1260_s18, %s1487_s0  ;;  %p923_p1 = scmp.lt.u32.totalorder %s921_s12, %s916_s15 }
  0x3d   : > { %p919_p5 = pnand %p918_p3, %p917_p0  ;;  %p925_p4 = scmp.lt.u32.totalorder %s916_s15, %s1260_s18 }
  0x3e   : > { %p924_p2 = por %p923_p1, %p922_p9 }
  0x3f   : > { %p920_p7 = pneg %p919_p5 }
  0x40   : > { %p926_p6 = por %p925_p4, %p924_p2 }
  0x42   : > { %p927_p8 = pnand %p926_p6, %p920_p7 }
  0x44   : > { %930 = shalt.err (!%p927_p8)
}
  0x45   : > { %s931_s13 = scalar_lea.vmem %s1262_s3, 128  ;;  %s1097_s17 = smov [#allocation2]  }
  0x46   : > { %p932_p12 = scmp.ne.s32.totalorder %s1262_s3, %s931_s13  ;;  %s936_s22 = sshll.u32 %s1097_s17, 4  ;;  %s937_s22 = int_to_ptr.vmem [resolvable:$false] %s936_s22 }
  0x47   : > { %s938_s8 = scalar_lea.vmem %s937_s22, 256  ;;  %p939_p5 = scmp.lt.s32.totalorder %s1262_s3, %s937_s22 }
  0x48   : > { %p934_p11 = pnand %p932_p12, %p918_p3  ;;  %p940_p9 = scmp.lt.s32.totalorder %s938_s8, %s931_s13 }
  0x4a   : > { %p935_p0 = pneg %p934_p11  ;;  %p941_p1 = por %p940_p9, %p939_p5 }
  0x4c   : > { %p942_p2 = pnand %p941_p1, %p935_p0 }
  0x4e   : > { %945 = shalt.err (!%p942_p2)
}
  0x4f   : > { %808 = dma.hbm_to_vmem [thread:$0]  (!%p1266_p13), %s1260_s18, 128, %s1262_s3, %s277_s19  }
  0x50   : > { %p1513_p7 = scmp.ne.s32.totalorder %s1505_s11, 0 }
  0x51   : > { %s1298_s15 = sand.u32 (!%p1513_p7), 1, %s1076_s25   ;;  %p1514_p3 = scmp.ne.s32.totalorder (!%p1513_p7), %s1503_s9, 0 }
  0x52   : > { %297 = sbr.rel (%p1513_p7) target bundleno = 920 (0x398), region = 40  ;;  %s744_s12 = sshll.u32 (!%p1513_p7), %s1298_s15, 3 }
  0x53   : > { %s300_s20 = scalar_lea.sflag (!%p1513_p7), [#allocation3], %s1298_s15  ;;  %s303_s16 = scalar_lea.vmem (!%p1513_p7), [#allocation2], %s744_s12 }
  0x59   : > { %1055 = dma.done.wait (%p1514_p3), %s300_s20, 128  }
  0x5a   : > { %1057 = vsyncadd (%p1514_p3), %s300_s20, 4294967168  ;;  %p1515_p4 = scmp.eq.s32.totalorder %s1182_s30, 0 }
  0x5c   : > { %1059 = dma.done.wait (%p1515_p4), [#allocation6], 512   ;;  %p1516_p13 = pmov %p1515_p4 }
  0x5d   : > { %vm351_vm0 = vcmask 261120   ;;  %v348_v0 = vld [vmem:[%s303_s16] sm:$0xff]  ;;  %v387_v7 = vld [vmem:[#allocation5] sm:$0xff]  ;;  %v388_v8 = vld [vmem:[#allocation5 + $0x8] sm:$0xff]  ;;  %v1098_v10 = vmov 0.0|0.0   ;;  %vm1099_vm1 = vmmov 0  }
  0x5e   : > { %1061 = vsyncadd (%p1516_p13), [#allocation6], 4294966784  ;;  %v352_v1 = vsel %vm351_vm0, %v348_v0, 0.0  ;;  %v389_v9 = vld [vmem:[#allocation5 + $0x10] sm:$0xff]  ;;  %783 = vmatprep.subr.bf16.mxu0 %v1098_v10  ;;  %v784_v11 = vpack.c.bf16 %v388_v8, %v387_v7  ;;  %v390_v12 = vld [vmem:[#allocation5 + $0x18] sm:$0xff]  ;;  %v1100_v13 = vmov 0.0  }
  0x5f   : > { %353 = vadd.xlane.f32.xlu0 %v352_v1  ;;  %780 = vmatprep.mubr.msk.f32.mxu0 %vm1099_vm1, %v1100_v13  ;;  %v787_v14 = vpack.c.bf16 %v390_v12, %v389_v9  ;;  %v749_v24 = vld [vmem:[%s1488_s1] ss:$0 sm:$0xff]  ;;  %s1320_s14 = sshll.u32 %s1298_s15, 5  ;;  %vm481_vm4 = vcmask 64512   ;;  %s1101_s17 = smov 104  }
  0x60   : > { %785 = vmatpush3.bf16.msra.mxu0 %v784_v11  ;;  %v750_v26 = vld [vmem:[%s1489_s2] ss:$0 sm:$0xff]  ;;  %s1102_s22 = smov 120   ;;  %s333_s8 = scalar_lea.vmem [#allocation7], %s1320_s14 }
  0x61   : > { %786 = vmatprep.subr.bf16.mxu0 %v1098_v10  ;;  %v751_v29 = vld [vmem:[%s1491_s4] ss:$0 sm:$0xff]  ;;  %s1103_s12 = smov 112   ;;  %s1104_s20 = smov 96  }
  0x62   : > { %s1500_s16 = smov 64   ;;  %s543_s3 = sshll.u32 %s333_s8, 4  ;;  %s1332_s3 = int_to_ptr.vmem [resolvable:$true] %s543_s3 }
  0x63   : > { %s1335_s9 = sshll.u32 %s1084_s27, 9  ;;  %s519_s13 = scalar_lea.sflag [#allocation4], %s1298_s15 }
  0x64   : > { %788 = vmatpush3.bf16.msra.mxu0 %v787_v14  ;;  %s1344_s19 = scalar_lea.hbm %s1492_s5, %s1335_s9  ;;  %s1106_s27 = smov [#allocation7]  }
  0xec   : > { %v354_v2 = vpop.xlane.xlu0 %353 }
  0xed   : > { %v356_v3 = vmul.f32 0.03125, %v354_v2 }
  0xef   : > { %v357_v4 = vsub.f32 %v348_v0, %v356_v3 }
  0xf1   : > { %v358_v5 = vmul.f32 %v357_v4, %v357_v4 }
  0xf3   : > { %v359_v6 = vsel %vm351_vm0, %v358_v5, 0.0 }
  0xf4   : > { %360 = vadd.xlane.f32.xlu0 %v359_v6 }
 0x181   : > { %v361_v15 = vpop.xlane.xlu0 %360 }
 0x182   : > { %v362_v16 = vmul.f32 0.032258064, %v361_v15 }
 0x184   : > { %884 = vrsqrt.f32 %v362_v16  ;;  %vm365_vm2 = vcmp.eq.f32.partialorder %v362_v16, inf  ;;  %v368_v19 = vand.u32 2147483648, %v362_v16  ;;  %vm367_vm3 = vcmp.eq.f32.partialorder %v362_v16, 0.0 }
 0x18e   : > { %v885_v17 = vpop.eup %884 }
 0x18f   : > { %v364_v18 = vmul.f32 %v885_v17, %v362_v16 }
 0x191   : > { %v366_v20 = vsel %vm365_vm2, %v362_v16, %v364_v18 }
 0x192   : > { %v369_v21 = vsel %vm367_vm3, %v368_v19, %v366_v20 }
 0x193   : > { %v370_v22 = vadd.f32 1e-05, %v369_v21 }
 0x195   : > { %886 = vrcp.f32 %v370_v22 }
 0x19f   : > { %v887_v23 = vpop.eup %886 }
 0x1a0   : > { %v372_v25 = vmul.f32 %v887_v23, %v357_v4 }
 0x1a2   : > { %v379_v27 = vmul.f32 %v749_v24, %v372_v25 }
 0x1a4   : > { %v386_v28 = vadd.f32 %v750_v26, %v379_v27 }
 0x1a6   : > { %781 = vmatmul.mubr.msk.f32.vlgmr.msra.gmra.mrb[0].mxu0 %vm351_vm0, %v386_v28 }
 0x279   : > { %v467_v30 = vpop.f32.mrb[0].mxu0 }
 0x27a   : > { %v468_v31 = vadd.f32 %v751_v29, %v467_v30  ;;  %v782_v32 = vpop.f32.mrb[1].mxu0 }
 0x27c   : > { %478 = vrot.lane.b32.xlu0 %v468_v31, %s1101_s17  ;;  %472 = vrot.lane.b32.xlu1 %v468_v31, %s1102_s22  ;;  %482 = vst.msk [vmem:[%s333_s8] sm:$0xff] %vm481_vm4, %v468_v31  ;;  %s946_s17 = scalar_lea.vmem %s1332_s3, 512  ;;  %s950_s22 = sshll.u32 %s1106_s27, 4  ;;  %s951_s22 = int_to_ptr.vmem [resolvable:$false] %s950_s22 }
 0x27d   : > { %p947_p6 = scmp.ne.s32.totalorder %s1332_s3, %s946_s17  ;;  %p953_p11 = scmp.lt.s32.totalorder %s1332_s3, %s951_s22 }
 0x27f   : > { %p948_p8 = pnand %p947_p6, %p1245_p10 }
 0x280   : > { %475 = vrot.lane.b32.xlu1 %v468_v31, %s1103_s12  ;;  %s952_s12 = scalar_lea.vmem %s951_s22, 1024 }
 0x281   : > { %p949_p12 = pneg %p948_p8  ;;  %p954_p0 = scmp.lt.s32.totalorder %s952_s12, %s946_s17 }
 0x283   : > { %p955_p5 = por %p954_p0, %p953_p11 }
 0x284   : > { %486 = vrot.lane.b32.xlu1 %v468_v31, %s1104_s20 }
 0x285   : > { %p956_p9 = pnand %p955_p5, %p949_p12 }
 0x288   : > { %502 = vrot.lane.b32.xlu1 %v468_v31, %s1500_s16 }
 0x2ee   : > { %v479_v33 = vpop.permute.xlu0 %478  ;;  %v473_v34 = vpop.permute.xlu1 %472 }
 0x2ef   : > { %485 = vst.msk [vmem:[%s333_s8 + $0x18] sm:$0xff] %vm481_vm4, %v479_v33  ;;  %483 = vst.msk [vmem:[%s333_s8 + $0x8] sm:$0xff] %vm481_vm4, %v473_v34  ;;  %488 = vrot.lane.b32.xlu1 %v473_v34, %s1104_s20 }
 0x2f2   : > { %v476_v35 = vpop.permute.xlu1 %475 }
 0x2f3   : > { %484 = vst.msk [vmem:[%s333_s8 + $0x10] sm:$0xff] %vm481_vm4, %v476_v35  ;;  %506 = vrot.lane.b32.xlu0 %v476_v35, %s1500_s16  ;;  %490 = vrot.lane.b32.xlu1 %v476_v35, %s1104_s20 }
 0x2f4   : > { %959 = shalt.err (!%p956_p9)
}
 0x2f5   : > { %s960_s8 = scalar_lea.hbm %s1344_s19, 512  ;;  %s964_s27 = scalar_lea.hbm %s1492_s5, 1024 }
 0x2f6   : > { %p961_p1 = scmp.ne.s32.totalorder %s1344_s19, %s960_s8  ;;  %p965_p3 = scmp.lt.u32.totalorder %s1344_s19, %s1492_s5 }
 0x2f7   : > { %p966_p4 = scmp.lt.u32.totalorder %s964_s27, %s960_s8  ;;  %p968_p6 = scmp.lt.u32.totalorder %s960_s8, %s1344_s19 }
 0x2f8   : > { %p962_p2 = pnand %p961_p1, %p1245_p10 }
 0x2f9   : > { %p967_p13 = por %p966_p4, %p965_p3 }
 0x2fa   : > { %p963_p7 = pneg %p962_p2 }
 0x2fb   : > { %p969_p8 = por %p968_p6, %p967_p13 }
 0x2fd   : > { %p970_p12 = pnand %p969_p8, %p963_p7 }
 0x2ff   : > { %973 = shalt.err (!%p970_p12)
}
 0x300   : > { %s1107_s17 = smov 128   ;;  %s1108_s12 = smov 8   ;;  %v487_v36 = vpop.permute.xlu1 %486  ;;  %492 = vrot.lane.b32.xlu1 %v479_v33, %s1104_s20 }
 0x301   : > { %795 = dma.vmem_to_hbm [thread:$0]  (%p1245_p10), %s1332_s3, 512, %s1344_s19, %s519_s13, %s1107_s17, %s1107_s17, %s1108_s12  }
 0x302   : > { %s340_s16 = scalar_lea.vmem [#allocation8], %s1320_s14  ;;  %s1377_s8 = scalar_lea.vmem [#allocation10], %s1320_s14 }
 0x303   : > { %498 = vst.msk [vmem:[%s340_s16] sm:$0xff] %vm481_vm4, %v487_v36  ;;  %s1517_s11 = smov 64   ;;  %s560_s15 = sshll.u32 %s340_s16, 4  ;;  %s1388_s15 = int_to_ptr.vmem [resolvable:$true] %s560_s15 }
 0x304   : > { %v503_v37 = vpop.permute.xlu1 %502  ;;  %504 = vrot.lane.b32.xlu1 %v473_v34, %s1517_s11  ;;  %s523_s3 = sand.u32 1, %s1182_s30   ;;  %s1394_s19 = scalar_lea.hbm %s1493_s6, %s1335_s9 }
 0x305   : > { %514 = vst.msk [vmem:[%s1377_s8] sm:$0xff] %vm481_vm4, %v503_v37  ;;  %s1397_s13 = scalar_lea.sflag [#allocation9], %s523_s3  ;;  %s974_s30 = scalar_lea.vmem %s1388_s15, 512 }
 0x306   : > { %p975_p11 = scmp.ne.s32.totalorder %s1388_s15, %s974_s30  ;;  %s1109_s18 = smov [#allocation8]  }
 0x307   : > { %s978_s27 = sshll.u32 %s1109_s18, 4  ;;  %s979_s27 = int_to_ptr.vmem [resolvable:$false] %s978_s27 }
 0x308   : > { %508 = vrot.lane.b32.xlu1 %v479_v33, %s1517_s11  ;;  %p976_p0 = pnand %p975_p11, %p1245_p10  ;;  %s980_s22 = scalar_lea.vmem %s979_s27, 1024 }
 0x309   : > { %p981_p9 = scmp.lt.s32.totalorder %s1388_s15, %s979_s27  ;;  %p982_p1 = scmp.lt.s32.totalorder %s980_s22, %s974_s30 }
 0x30a   : > { %p977_p5 = pneg %p976_p0 }
 0x30b   : > { %p983_p2 = por %p982_p1, %p981_p9 }
 0x30d   : > { %p984_p7 = pnand %p983_p2, %p977_p5 }
 0x361   : > { %v489_v38 = vpop.permute.xlu1 %488 }
 0x362   : > { %499 = vst.msk [vmem:[%s340_s16 + $0x8] sm:$0xff] %vm481_vm4, %v489_v38 }
 0x365   : > { %v507_v39 = vpop.permute.xlu0 %506  ;;  %v491_v40 = vpop.permute.xlu1 %490 }
 0x366   : > { %516 = vst.msk [vmem:[%s1377_s8 + $0x10] sm:$0xff] %vm481_vm4, %v507_v39  ;;  %500 = vst.msk [vmem:[%s340_s16 + $0x10] sm:$0xff] %vm481_vm4, %v491_v40 }
 0x372   : > { %v493_v41 = vpop.permute.xlu1 %492 }
 0x373   : > { %501 = vst.msk [vmem:[%s340_s16 + $0x18] sm:$0xff] %vm481_vm4, %v493_v41 }
 0x374   : > { %987 = shalt.err (!%p984_p7)
}
 0x375   : > { %s988_s16 = scalar_lea.hbm %s1394_s19, 512  ;;  %s992_s14 = scalar_lea.hbm %s1493_s6, 1024 }
 0x376   : > { %p989_p3 = scmp.ne.s32.totalorder %s1394_s19, %s988_s16  ;;  %p993_p6 = scmp.lt.u32.totalorder %s1394_s19, %s1493_s6 }
 0x377   : > { %p994_p8 = scmp.lt.u32.totalorder %s992_s14, %s988_s16  ;;  %p996_p11 = scmp.lt.u32.totalorder %s988_s16, %s1394_s19 }
 0x378   : > { %p990_p4 = pnand %p989_p3, %p1245_p10 }
 0x379   : > { %p995_p12 = por %p994_p8, %p993_p6 }
 0x37a   : > { %p991_p13 = pneg %p990_p4 }
 0x37b   : > { %p997_p0 = por %p996_p11, %p995_p12 }
 0x37d   : > { %p998_p5 = pnand %p997_p0, %p991_p13 }
 0x37f   : > { %1001 = shalt.err (!%p998_p5)
}
 0x380   : > { %796 = dma.vmem_to_hbm [thread:$0]  (%p1245_p10), %s1388_s15, 512, %s1394_s19, %s1397_s13, %s1107_s17, %s1107_s17, %s1108_s12   ;;  %v505_v42 = vpop.permute.xlu1 %504 }
 0x381   : > { %s577_s30 = sshll.u32 %s1377_s8, 4  ;;  %515 = vst.msk [vmem:[%s1377_s8 + $0x8] sm:$0xff] %vm481_vm4, %v505_v42  ;;  %s1433_s16 = scalar_lea.hbm %s1494_s7, %s1335_s9  ;;  %s1427_s30 = int_to_ptr.vmem [resolvable:$true] %s577_s30 }
 0x382   : > { %s1002_s11 = scalar_lea.vmem %s1427_s30, 512  ;;  %s1110_s15 = smov [#allocation10]  }
 0x383   : > { %p1003_p9 = scmp.ne.s32.totalorder %s1427_s30, %s1002_s11  ;;  %s1006_s19 = sshll.u32 %s1110_s15, 4  ;;  %s1007_s19 = int_to_ptr.vmem [resolvable:$false] %s1006_s19 }
 0x384   : > { %v509_v43 = vpop.permute.xlu1 %508  ;;  %s1008_s3 = scalar_lea.vmem %s1007_s19, 1024  ;;  %p1009_p7 = scmp.lt.s32.totalorder %s1427_s30, %s1007_s19 }
 0x385   : > { %517 = vst.msk [vmem:[%s1377_s8 + $0x18] sm:$0xff] %vm481_vm4, %v509_v43  ;;  %p1004_p1 = pnand %p1003_p9, %p1245_p10  ;;  %p1010_p3 = scmp.lt.s32.totalorder %s1008_s3, %s1002_s11 }
 0x387   : > { %p1005_p2 = pneg %p1004_p1  ;;  %p1011_p4 = por %p1010_p3, %p1009_p7 }
 0x389   : > { %p1012_p13 = pnand %p1011_p4, %p1005_p2 }
 0x38b   : > { %1015 = shalt.err (!%p1012_p13)
}
 0x38c   : > { %s1016_s9 = scalar_lea.hbm %s1433_s16, 512  ;;  %s1020_s20 = scalar_lea.hbm %s1494_s7, 1024 }
 0x38d   : > { %p1017_p6 = scmp.ne.s32.totalorder %s1433_s16, %s1016_s9  ;;  %p1021_p11 = scmp.lt.u32.totalorder %s1433_s16, %s1494_s7 }
 0x38e   : > { %p1022_p0 = scmp.lt.u32.totalorder %s1020_s20, %s1016_s9  ;;  %p1024_p9 = scmp.lt.u32.totalorder %s1016_s9, %s1433_s16 }
 0x38f   : > { %p1018_p8 = pnand %p1017_p6, %p1245_p10 }
 0x390   : > { %p1023_p5 = por %p1022_p0, %p1021_p11 }
 0x391   : > { %p1019_p12 = pneg %p1018_p8 }
 0x392   : > { %p1025_p1 = por %p1024_p9, %p1023_p5 }
 0x394   : > { %p1026_p2 = pnand %p1025_p1, %p1019_p12 }
 0x396   : > { %1029 = shalt.err (!%p1026_p2)
}
 0x397   : > { %797 = dma.vmem_to_hbm [thread:$0]  (%p1245_p10), %s1427_s30, 512, %s1433_s16, %s1397_s13, %s1107_s17, %s1107_s17, %s1108_s12  }
 0x398 PF: > { %s592_s22 = sand.u32 1, %s1072_s24   ;;  %p1518_p7 = scmp.ne.s32.totalorder %s1504_s10, 0 }
 0x399   : > { %p1519_p3 = scmp.ge.s32.totalorder %s1092_s29, 2  ;;  %s593_s11 = scalar_lea.sflag [#allocation4], %s592_s22 }
 0x39b   : > { %p810_p4 = pnand %p1519_p3, %p1518_p7 }
 0x39d   : > { %1063 = dma.done.wait (!%p810_p4), %s593_s11, 512  }
 0x39e   : > { %1065 = vsyncadd (!%p810_p4), %s593_s11, 4294966784  ;;  %s1520_s21 = sadd.s32 4294967294, %s1092_s29  }
 0x39f   : > { %s601_s15 = sand.u32 1, %s1520_s21  }
 0x3a0   : > { %s602_s19 = scalar_lea.sflag [#allocation9], %s601_s15 }
 0x3a1   : > { %1067 = dma.done.wait (!%p810_p4), %s602_s19, 1024  }
 0x3a2   : > { %1069 = vsyncadd (!%p810_p4), %s602_s19, 4294966272  ;;  %s28_s29 = sadd.s32 1, %s1092_s29   ;;  %s1521_s17 = sld [smem:[#allocation15_spill]] }
 0x3a3   : > { %p25_p10 = scmp.ge.s32.totalorder %s28_s29, 4   ;;  %s1522_s24 = smov %s1076_s25 }
 0x3a4   : > { %s1523_s25 = smov %s1080_s26  ;;  %s1524_s26 = smov %s1254_s23 }
 0x3a5   : > { %s1525_s27 = smov %s1088_s28  ;;  %27 = sbr.rel (!%p25_p10) target bundleno = 11 (0xb), region = 121 }
 0x3a8   : > { %s1526_s28 = smov %s1521_s17 }
 0x3ac   :  { %616 = vsyncpa [#allocation3], 1 }
 0x3ad   :  { %618 = vsyncpa [#allocation3 + $0x1], 1 }
 0x3ae   :  { %619 = vsyncpa [#allocation6], 1 }
 0x3af   :  { %620 = vsyncpa [#allocation4], 1 }
 0x3b0   :  { %622 = vsyncpa [#allocation4 + $0x1], 1 }
 0x3b1   :  { %623 = vsyncpa [#allocation9], 1 }
 0x3b2   :  { %625 = vsyncpa [#allocation9 + $0x1], 1 }

// kernel: tpu_custom_call.1
= control target key start
LH: loop header
LB: loop body
LE: loop exit
PB: predicated region body
PF: predicated region fallthrough
CT: control target
= control target key end

     0   :  { %s1487_s0 = inlined_call_operand.hbm [shape: f32[2,8,32], index: 0, kind: input, shape index: {}]   ;;  %s1488_s1 = inlined_call_operand.vmem [shape: f32[1,32], index: 1, kind: input, shape index: {}]   ;;  %s1489_s2 = inlined_call_operand.vmem [shape: f32[1,32], index: 2, kind: input, shape index: {}]   ;;  %s1490_s3 = inlined_call_operand.hbm [shape: f32[32,96], index: 3, kind: input, shape index: {}]   ;;  %s1491_s4 = inlined_call_operand.vmem [shape: f32[1,96], index: 4, kind: input, shape index: {}]   ;;  %s1492_s5 = inlined_call_operand.hbm [shape: f32[2,4,8,8], index: 5, kind: output, shape index: {0}]   ;;  %s1493_s6 = inlined_call_operand.hbm [shape: f32[2,4,8,8], index: 6, kind: output, shape index: {1}]   ;;  %s1494_s7 = inlined_call_operand.hbm [shape: f32[2,4,8,8], index: 7, kind: output, shape index: {2}]  }
   0x1   :  { %1502 = sst [smem:[#allocation16_spill]] %s1490_s3 }
   0x2   :  { %13 = vsyncpa [#allocation3], 0 }
   0x3   :  { %15 = vsyncpa [#allocation3 + $0x1], 0 }
   0x4   :  { %16 = vsyncpa [#allocation6], 0 }
   0x5   :  { %17 = vsyncpa [#allocation4], 0 }
   0x6   :  { %19 = vsyncpa [#allocation4 + $0x1], 0 }
   0x7   :  { %20 = vsyncpa [#allocation9], 0 }
   0x8   :  { %22 = vsyncpa [#allocation9 + $0x1], 0  ;;  %s1151_s24 = smov 0   ;;  %s1153_s25 = smov 0  }
   0x9   :  { %s1155_s26 = smov 0   ;;  %s1157_s27 = smov 0  }
   0xa   :  { %s1159_s28 = smov 0   ;;  %s1161_s29 = smov 0  }
   0xb LB: > { %s1182_s30 = sadd.s32 4294967295, %s1092_s29   ;;  %s1498_s8 = sadd.s32 4294967294, %s1092_s29   ;;  %s1092_s29 = sphi %s1161_s29, %s28_s29   ;;  %s1088_s28 = sphi %s1159_s28, %s1526_s28   ;;  %s1084_s27 = sphi %s1157_s27, %s1525_s27   ;;  %s1080_s26 = sphi %s1155_s26, %s1524_s26   ;;  %s1076_s25 = sphi %s1153_s25, %s1523_s25   ;;  %s1072_s24 = sphi %s1151_s24, %s1522_s24  }
   0xc   : > { %p62_p0 = scmp.ne.s32.totalorder %s1076_s25, %s1072_s24  ;;  %p1495_p1 = scmp.eq.s32.totalorder %s1182_s30, 0 }
   0xd   : > { %p178_p3 = scmp.eq.s32.totalorder %s1498_s8, 1  ;;  %p738_p5 = scmp.ge.s32.totalorder %s1092_s29, 1 }
   0xe   : > { %p1193_p4 = por %p1495_p1, %p62_p0  ;;  %p241_p7 = scmp.lt.s32.totalorder %s1092_s29, 3 }
   0xf   : > { %p1198_p6 = por %p178_p3, %p62_p0  ;;  %s1094_s12 = smov [#allocation5]  }
  0x10   : > { %s1503_s9 = scalar_select %p1193_p4, 1, 0 }
  0x11   : > { %s1504_s10 = scalar_select %p1198_p6, 1, 0 }
  0x12   : > { %p1203_p8 = pnand %p738_p5, %p241_p7  ;;  %s259_s13 = sshll.u32 %s1094_s12, 4  ;;  %s260_s13 = int_to_ptr.vmem [resolvable:$true] %s259_s13 }
  0x13   : > { %s40_s15 = sadd.s32 1, %s1088_s28  ;;  %s1507_s3 = sld [smem:[#allocation16_spill]] }
  0x14   : > { %s1505_s11 = scalar_select %p1203_p8, 1, 0 }
  0x15   : > { %p801_p9 = pneg %p1203_p8 }
  0x17   : > { %p1212_p11 = pnand %p801_p9, %p1495_p1 }
  0x19   : > { %s888_s18 = scalar_lea.hbm %s1507_s3, 512  ;;  %p890_p13 = pneg %p1212_p11 }
  0x1a   : > { %p889_p12 = scmp.ne.s32.totalorder %s1507_s3, %s888_s18  ;;  %p895_p5 = scmp.lt.u32.totalorder %s888_s18, %s1507_s3 }
  0x1c   : > { %p891_p0 = pnand %p890_p13, %p889_p12 }
  0x1e   : > { %p892_p3 = pneg %p891_p0 }
  0x20   : > { %p897_p7 = pnand %p895_p5, %p892_p3 }
  0x22   : > { %900 = shalt.err (!%p897_p7)
}
  0x23   : > { %s901_s23 = scalar_lea.vmem %s260_s13, 512  ;;  %p909_p2 = scmp.lt.s32.totalorder %s260_s13, %s260_s13 }
  0x24   : > { %p902_p9 = scmp.ne.s32.totalorder %s260_s13, %s901_s23  ;;  %p910_p6 = scmp.lt.s32.totalorder %s901_s23, %s901_s23 }
  0x26   : > { %p904_p10 = pnand %p902_p9, %p890_p13  ;;  %p911_p4 = por %p910_p6, %p909_p2 }
  0x28   : > { %p905_p1 = pneg %p904_p10 }
  0x2a   : > { %p912_p8 = pnand %p911_p4, %p905_p1 }
  0x2c   : > { %915 = shalt.err (!%p912_p8)
}
  0x2d   : > { %s1095_s12 = smov 128   ;;  %s1096_s16 = smov 8  }
  0x2e   : > { %804 = dma.hbm_to_vmem [thread:$0]  (!%p1212_p11), %s1507_s3, 512, %s260_s13, [#allocation6], %s1095_s12, %s1095_s12, %s1096_s16  }
  0x2f   : > { %p42_p1 = scmp.ge.s32.totalorder %s40_s15, 2  ;;  %s49_s19 = sadd.s32 1, %s1080_s26 }
  0x30   : > { %p56_p2 = scmp.ne.s32.totalorder %s1080_s26, %s1076_s25  ;;  %p57_p4 = scmp.eq.s32.totalorder %s1092_s29, 0 }
  0x31   : > { %s1528_s15 = smov (%p42_p1, %s40_s15), 0  ;;  %p1510_p8 = scmp.eq.s32.totalorder %s1182_s30, 1 }
  0x32   : > { %1508 = sst [smem:[#allocation15_spill]] %s1528_s15  ;;  %p1239_p6 = por %p57_p4, %p56_p2 }
  0x33   : > { %p1245_p10 = por %p1510_p8, %p56_p2  ;;  %s44_s14 = ssub.s32 %s1088_s28, %s1528_s15 }
  0x34   : > { %p820_p12 = scmp.lt.s32.totalorder %s1092_s29, 2  ;;  %p47_p11 = scmp.eq.s32.totalorder %s44_s14, 0 }
  0x35   : > { %s276_s13 = sand.u32 1, %s1080_s26   ;;  %s742_s12 = sshll.u32 %s1088_s28, 7 }
  0x36   : > { %s741_s22 = sshll.u32 %s276_s13, 3  ;;  %s1260_s18 = scalar_lea.hbm %s1487_s0, %s742_s12 }
  0x37   : > { %s1254_s23 = scalar_select %p47_p11, %s1080_s26, %s49_s19  }
  0x38   : > { %s280_s8 = scalar_lea.vmem [#allocation2], %s741_s22  ;;  %p1266_p13 = pnand %p820_p12, %p1239_p6 }
  0x39   : > { %s288_s3 = sshll.u32 %s280_s8, 4  ;;  %s277_s19 = scalar_lea.sflag [#allocation3], %s276_s13  ;;  %s1262_s3 = int_to_ptr.vmem [resolvable:$true] %s288_s3 }
  0x3a   : > { %s916_s15 = scalar_lea.hbm %s1260_s18, 128  ;;  %p918_p3 = pneg %p1266_p13 }
  0x3b   : > { %p917_p0 = scmp.ne.s32.totalorder %s1260_s18, %s916_s15  ;;  %s921_s12 = scalar_lea.hbm %s1487_s0, 256 }
  0x3c   : > { %p922_p9 = scmp.lt.u32.totalorder %s1260_s18, %s1487_s0  ;;  %p923_p1 = scmp.lt.u32.totalorder %s921_s12, %s916_s15 }
  0x3d   : > { %p919_p5 = pnand %p918_p3, %p917_p0  ;;  %p925_p4 = scmp.lt.u32.totalorder %s916_s15, %s1260_s18 }
  0x3e   : > { %p924_p2 = por %p923_p1, %p922_p9 }
  0x3f   : > { %p920_p7 = pneg %p919_p5 }
  0x40   : > { %p926_p6 = por %p925_p4, %p924_p2 }
  0x42   : > { %p927_p8 = pnand %p926_p6, %p920_p7 }
  0x44   : > { %930 = shalt.err (!%p927_p8)
}
  0x45   : > { %s931_s13 = scalar_lea.vmem %s1262_s3, 128  ;;  %s1097_s17 = smov [#allocation2]  }
  0x46   : > { %p932_p12 = scmp.ne.s32.totalorder %s1262_s3, %s931_s13  ;;  %s936_s22 = sshll.u32 %s1097_s17, 4  ;;  %s937_s22 = int_to_ptr.vmem [resolvable:$false] %s936_s22 }
  0x47   : > { %s938_s8 = scalar_lea.vmem %s937_s22, 256  ;;  %p939_p5 = scmp.lt.s32.totalorder %s1262_s3, %s937_s22 }
  0x48   : > { %p934_p11 = pnand %p932_p12, %p918_p3  ;;  %p940_p9 = scmp.lt.s32.totalorder %s938_s8, %s931_s13 }
  0x4a   : > { %p935_p0 = pneg %p934_p11  ;;  %p941_p1 = por %p940_p9, %p939_p5 }
  0x4c   : > { %p942_p2 = pnand %p941_p1, %p935_p0 }
  0x4e   : > { %945 = shalt.err (!%p942_p2)
}
  0x4f   : > { %808 = dma.hbm_to_vmem [thread:$0]  (!%p1266_p13), %s1260_s18, 128, %s1262_s3, %s277_s19  }
  0x50   : > { %p1513_p7 = scmp.ne.s32.totalorder %s1505_s11, 0 }
  0x51   : > { %s1298_s15 = sand.u32 (!%p1513_p7), 1, %s1076_s25   ;;  %p1514_p3 = scmp.ne.s32.totalorder (!%p1513_p7), %s1503_s9, 0 }
  0x52   : > { %297 = sbr.rel (%p1513_p7) target bundleno = 920 (0x398), region = 40  ;;  %s744_s12 = sshll.u32 (!%p1513_p7), %s1298_s15, 3 }
  0x53   : > { %s300_s20 = scalar_lea.sflag (!%p1513_p7), [#allocation3], %s1298_s15  ;;  %s303_s16 = scalar_lea.vmem (!%p1513_p7), [#allocation2], %s744_s12 }
  0x59   : > { %1055 = dma.done.wait (%p1514_p3), %s300_s20, 128  }
  0x5a   : > { %1057 = vsyncadd (%p1514_p3), %s300_s20, 4294967168  ;;  %p1515_p4 = scmp.eq.s32.totalorder %s1182_s30, 0 }
  0x5c   : > { %1059 = dma.done.wait (%p1515_p4), [#allocation6], 512   ;;  %p1516_p13 = pmov %p1515_p4 }
  0x5d   : > { %vm351_vm0 = vcmask 261120   ;;  %v348_v0 = vld [vmem:[%s303_s16] sm:$0xff]  ;;  %v387_v7 = vld [vmem:[#allocation5] sm:$0xff]  ;;  %v388_v8 = vld [vmem:[#allocation5 + $0x8] sm:$0xff]  ;;  %v1098_v10 = vmov 0.0|0.0   ;;  %vm1099_vm1 = vmmov 0  }
  0x5e   : > { %1061 = vsyncadd (%p1516_p13), [#allocation6], 4294966784  ;;  %v352_v1 = vsel %vm351_vm0, %v348_v0, 0.0  ;;  %v389_v9 = vld [vmem:[#allocation5 + $0x10] sm:$0xff]  ;;  %783 = vmatprep.subr.bf16.mxu0 %v1098_v10  ;;  %v784_v11 = vpack.c.bf16 %v388_v8, %v387_v7  ;;  %v390_v12 = vld [vmem:[#allocation5 + $0x18] sm:$0xff]  ;;  %v1100_v13 = vmov 0.0  }
  0x5f   : > { %353 = vadd.xlane.f32.xlu0 %v352_v1  ;;  %780 = vmatprep.mubr.msk.f32.mxu0 %vm1099_vm1, %v1100_v13  ;;  %v787_v14 = vpack.c.bf16 %v390_v12, %v389_v9  ;;  %v749_v24 = vld [vmem:[%s1488_s1] ss:$0 sm:$0xff]  ;;  %s1320_s14 = sshll.u32 %s1298_s15, 5  ;;  %vm481_vm4 = vcmask 64512   ;;  %s1101_s17 = smov 104  }
  0x60   : > { %785 = vmatpush3.bf16.msra.mxu0 %v784_v11  ;;  %v750_v26 = vld [vmem:[%s1489_s2] ss:$0 sm:$0xff]  ;;  %s1102_s22 = smov 120   ;;  %s333_s8 = scalar_lea.vmem [#allocation7], %s1320_s14 }
  0x61   : > { %786 = vmatprep.subr.bf16.mxu0 %v1098_v10  ;;  %v751_v29 = vld [vmem:[%s1491_s4] ss:$0 sm:$0xff]  ;;  %s1103_s12 = smov 112   ;;  %s1104_s20 = smov 96  }
  0x62   : > { %s1500_s16 = smov 64   ;;  %s543_s3 = sshll.u32 %s333_s8, 4  ;;  %s1332_s3 = int_to_ptr.vmem [resolvable:$true] %s543_s3 }
  0x63   : > { %s1335_s9 = sshll.u32 %s1084_s27, 9  ;;  %s519_s13 = scalar_lea.sflag [#allocation4], %s1298_s15 }
  0x64   : > { %788 = vmatpush3.bf16.msra.mxu0 %v787_v14  ;;  %s1344_s19 = scalar_lea.hbm %s1492_s5, %s1335_s9  ;;  %s1106_s27 = smov [#allocation7]  }
  0xec   : > { %v354_v2 = vpop.xlane.xlu0 %353 }
  0xed   : > { %v356_v3 = vmul.f32 0.03125, %v354_v2 }
  0xef   : > { %v357_v4 = vsub.f32 %v348_v0, %v356_v3 }
  0xf1   : > { %v358_v5 = vmul.f32 %v357_v4, %v357_v4 }
  0xf3   : > { %v359_v6 = vsel %vm351_vm0, %v358_v5, 0.0 }
  0xf4   : > { %360 = vadd.xlane.f32.xlu0 %v359_v6 }
 0x181   : > { %v361_v15 = vpop.xlane.xlu0 %360 }
 0x182   : > { %v362_v16 = vmul.f32 0.032258064, %v361_v15 }
 0x184   : > { %884 = vrsqrt.f32 %v362_v16  ;;  %vm365_vm2 = vcmp.eq.f32.partialorder %v362_v16, inf  ;;  %v368_v19 = vand.u32 2147483648, %v362_v16  ;;  %vm367_vm3 = vcmp.eq.f32.partialorder %v362_v16, 0.0 }
 0x18e   : > { %v885_v17 = vpop.eup %884 }
 0x18f   : > { %v364_v18 = vmul.f32 %v885_v17, %v362_v16 }
 0x191   : > { %v366_v20 = vsel %vm365_vm2, %v362_v16, %v364_v18 }
 0x192   : > { %v369_v21 = vsel %vm367_vm3, %v368_v19, %v366_v20 }
 0x193   : > { %v370_v22 = vadd.f32 1e-05, %v369_v21 }
 0x195   : > { %886 = vrcp.f32 %v370_v22 }
 0x19f   : > { %v887_v23 = vpop.eup %886 }
 0x1a0   : > { %v372_v25 = vmul.f32 %v887_v23, %v357_v4 }
 0x1a2   : > { %v379_v27 = vmul.f32 %v749_v24, %v372_v25 }
 0x1a4   : > { %v386_v28 = vadd.f32 %v750_v26, %v379_v27 }
 0x1a6   : > { %781 = vmatmul.mubr.msk.f32.vlgmr.msra.gmra.mrb[0].mxu0 %vm351_vm0, %v386_v28 }
 0x279   : > { %v467_v30 = vpop.f32.mrb[0].mxu0 }
 0x27a   : > { %v468_v31 = vadd.f32 %v751_v29, %v467_v30  ;;  %v782_v32 = vpop.f32.mrb[1].mxu0 }
 0x27c   : > { %478 = vrot.lane.b32.xlu0 %v468_v31, %s1101_s17  ;;  %472 = vrot.lane.b32.xlu1 %v468_v31, %s1102_s22  ;;  %482 = vst.msk [vmem:[%s333_s8] sm:$0xff] %vm481_vm4, %v468_v31  ;;  %s946_s17 = scalar_lea.vmem %s1332_s3, 512  ;;  %s950_s22 = sshll.u32 %s1106_s27, 4  ;;  %s951_s22 = int_to_ptr.vmem [resolvable:$false] %s950_s22 }
 0x27d   : > { %p947_p6 = scmp.ne.s32.totalorder %s1332_s3, %s946_s17  ;;  %p953_p11 = scmp.lt.s32.totalorder %s1332_s3, %s951_s22 }
 0x27f   : > { %p948_p8 = pnand %p947_p6, %p1245_p10 }
 0x280   : > { %475 = vrot.lane.b32.xlu1 %v468_v31, %s1103_s12  ;;  %s952_s12 = scalar_lea.vmem %s951_s22, 1024 }
 0x281   : > { %p949_p12 = pneg %p948_p8  ;;  %p954_p0 = scmp.lt.s32.totalorder %s952_s12, %s946_s17 }
 0x283   : > { %p955_p5 = por %p954_p0, %p953_p11 }
 0x284   : > { %486 = vrot.lane.b32.xlu1 %v468_v31, %s1104_s20 }
 0x285   : > { %p956_p9 = pnand %p955_p5, %p949_p12 }
 0x288   : > { %502 = vrot.lane.b32.xlu1 %v468_v31, %s1500_s16 }
 0x2ee   : > { %v479_v33 = vpop.permute.xlu0 %478  ;;  %v473_v34 = vpop.permute.xlu1 %472 }
 0x2ef   : > { %485 = vst.msk [vmem:[%s333_s8 + $0x18] sm:$0xff] %vm481_vm4, %v479_v33  ;;  %483 = vst.msk [vmem:[%s333_s8 + $0x8] sm:$0xff] %vm481_vm4, %v473_v34  ;;  %488 = vrot.lane.b32.xlu1 %v473_v34, %s1104_s20 }
 0x2f2   : > { %v476_v35 = vpop.permute.xlu1 %475 }
 0x2f3   : > { %484 = vst.msk [vmem:[%s333_s8 + $0x10] sm:$0xff] %vm481_vm4, %v476_v35  ;;  %506 = vrot.lane.b32.xlu0 %v476_v35, %s1500_s16  ;;  %490 = vrot.lane.b32.xlu1 %v476_v35, %s1104_s20 }
 0x2f4   : > { %959 = shalt.err (!%p956_p9)
}
 0x2f5   : > { %s960_s8 = scalar_lea.hbm %s1344_s19, 512  ;;  %s964_s27 = scalar_lea.hbm %s1492_s5, 1024 }
 0x2f6   : > { %p961_p1 = scmp.ne.s32.totalorder %s1344_s19, %s960_s8  ;;  %p965_p3 = scmp.lt.u32.totalorder %s1344_s19, %s1492_s5 }
 0x2f7   : > { %p966_p4 = scmp.lt.u32.totalorder %s964_s27, %s960_s8  ;;  %p968_p6 = scmp.lt.u32.totalorder %s960_s8, %s1344_s19 }
 0x2f8   : > { %p962_p2 = pnand %p961_p1, %p1245_p10 }
 0x2f9   : > { %p967_p13 = por %p966_p4, %p965_p3 }
 0x2fa   : > { %p963_p7 = pneg %p962_p2 }
 0x2fb   : > { %p969_p8 = por %p968_p6, %p967_p13 }
 0x2fd   : > { %p970_p12 = pnand %p969_p8, %p963_p7 }
 0x2ff   : > { %973 = shalt.err (!%p970_p12)
}
 0x300   : > { %s1107_s17 = smov 128   ;;  %s1108_s12 = smov 8   ;;  %v487_v36 = vpop.permute.xlu1 %486  ;;  %492 = vrot.lane.b32.xlu1 %v479_v33, %s1104_s20 }
 0x301   : > { %795 = dma.vmem_to_hbm [thread:$0]  (%p1245_p10), %s1332_s3, 512, %s1344_s19, %s519_s13, %s1107_s17, %s1107_s17, %s1108_s12  }
 0x302   : > { %s340_s16 = scalar_lea.vmem [#allocation8], %s1320_s14  ;;  %s1377_s8 = scalar_lea.vmem [#allocation10], %s1320_s14 }
 0x303   : > { %498 = vst.msk [vmem:[%s340_s16] sm:$0xff] %vm481_vm4, %v487_v36  ;;  %s1517_s11 = smov 64   ;;  %s560_s15 = sshll.u32 %s340_s16, 4  ;;  %s1388_s15 = int_to_ptr.vmem [resolvable:$true] %s560_s15 }
 0x304   : > { %v503_v37 = vpop.permute.xlu1 %502  ;;  %504 = vrot.lane.b32.xlu1 %v473_v34, %s1517_s11  ;;  %s523_s3 = sand.u32 1, %s1182_s30   ;;  %s1394_s19 = scalar_lea.hbm %s1493_s6, %s1335_s9 }
 0x305   : > { %514 = vst.msk [vmem:[%s1377_s8] sm:$0xff] %vm481_vm4, %v503_v37  ;;  %s1397_s13 = scalar_lea.sflag [#allocation9], %s523_s3  ;;  %s974_s30 = scalar_lea.vmem %s1388_s15, 512 }
 0x306   : > { %p975_p11 = scmp.ne.s32.totalorder %s1388_s15, %s974_s30  ;;  %s1109_s18 = smov [#allocation8]  }
 0x307   : > { %s978_s27 = sshll.u32 %s1109_s18, 4  ;;  %s979_s27 = int_to_ptr.vmem [resolvable:$false] %s978_s27 }
 0x308   : > { %508 = vrot.lane.b32.xlu1 %v479_v33, %s1517_s11  ;;  %p976_p0 = pnand %p975_p11, %p1245_p10  ;;  %s980_s22 = scalar_lea.vmem %s979_s27, 1024 }
 0x309   : > { %p981_p9 = scmp.lt.s32.totalorder %s1388_s15, %s979_s27  ;;  %p982_p1 = scmp.lt.s32.totalorder %s980_s22, %s974_s30 }
 0x30a   : > { %p977_p5 = pneg %p976_p0 }
 0x30b   : > { %p983_p2 = por %p982_p1, %p981_p9 }
 0x30d   : > { %p984_p7 = pnand %p983_p2, %p977_p5 }
 0x361   : > { %v489_v38 = vpop.permute.xlu1 %488 }
 0x362   : > { %499 = vst.msk [vmem:[%s340_s16 + $0x8] sm:$0xff] %vm481_vm4, %v489_v38 }
 0x365   : > { %v507_v39 = vpop.permute.xlu0 %506  ;;  %v491_v40 = vpop.permute.xlu1 %490 }
 0x366   : > { %516 = vst.msk [vmem:[%s1377_s8 + $0x10] sm:$0xff] %vm481_vm4, %v507_v39  ;;  %500 = vst.msk [vmem:[%s340_s16 + $0x10] sm:$0xff] %vm481_vm4, %v491_v40 }
 0x372   : > { %v493_v41 = vpop.permute.xlu1 %492 }
 0x373   : > { %501 = vst.msk [vmem:[%s340_s16 + $0x18] sm:$0xff] %vm481_vm4, %v493_v41 }
 0x374   : > { %987 = shalt.err (!%p984_p7)
}
 0x375   : > { %s988_s16 = scalar_lea.hbm %s1394_s19, 512  ;;  %s992_s14 = scalar_lea.hbm %s1493_s6, 1024 }
 0x376   : > { %p989_p3 = scmp.ne.s32.totalorder %s1394_s19, %s988_s16  ;;  %p993_p6 = scmp.lt.u32.totalorder %s1394_s19, %s1493_s6 }
 0x377   : > { %p994_p8 = scmp.lt.u32.totalorder %s992_s14, %s988_s16  ;;  %p996_p11 = scmp.lt.u32.totalorder %s988_s16, %s1394_s19 }
 0x378   : > { %p990_p4 = pnand %p989_p3, %p1245_p10 }
 0x379   : > { %p995_p12 = por %p994_p8, %p993_p6 }
 0x37a   : > { %p991_p13 = pneg %p990_p4 }
 0x37b   : > { %p997_p0 = por %p996_p11, %p995_p12 }
 0x37d   : > { %p998_p5 = pnand %p997_p0, %p991_p13 }
 0x37f   : > { %1001 = shalt.err (!%p998_p5)
}
 0x380   : > { %796 = dma.vmem_to_hbm [thread:$0]  (%p1245_p10), %s1388_s15, 512, %s1394_s19, %s1397_s13, %s1107_s17, %s1107_s17, %s1108_s12   ;;  %v505_v42 = vpop.permute.xlu1 %504 }
 0x381   : > { %s577_s30 = sshll.u32 %s1377_s8, 4  ;;  %515 = vst.msk [vmem:[%s1377_s8 + $0x8] sm:$0xff] %vm481_vm4, %v505_v42  ;;  %s1433_s16 = scalar_lea.hbm %s1494_s7, %s1335_s9  ;;  %s1427_s30 = int_to_ptr.vmem [resolvable:$true] %s577_s30 }
 0x382   : > { %s1002_s11 = scalar_lea.vmem %s1427_s30, 512  ;;  %s1110_s15 = smov [#allocation10]  }
 0x383   : > { %p1003_p9 = scmp.ne.s32.totalorder %s1427_s30, %s1002_s11  ;;  %s1006_s19 = sshll.u32 %s1110_s15, 4  ;;  %s1007_s19 = int_to_ptr.vmem [resolvable:$false] %s1006_s19 }
 0x384   : > { %v509_v43 = vpop.permute.xlu1 %508  ;;  %s1008_s3 = scalar_lea.vmem %s1007_s19, 1024  ;;  %p1009_p7 = scmp.lt.s32.totalorder %s1427_s30, %s1007_s19 }
 0x385   : > { %517 = vst.msk [vmem:[%s1377_s8 + $0x18] sm:$0xff] %vm481_vm4, %v509_v43  ;;  %p1004_p1 = pnand %p1003_p9, %p1245_p10  ;;  %p1010_p3 = scmp.lt.s32.totalorder %s1008_s3, %s1002_s11 }
 0x387   : > { %p1005_p2 = pneg %p1004_p1  ;;  %p1011_p4 = por %p1010_p3, %p1009_p7 }
 0x389   : > { %p1012_p13 = pnand %p1011_p4, %p1005_p2 }
 0x38b   : > { %1015 = shalt.err (!%p1012_p13)
}
 0x38c   : > { %s1016_s9 = scalar_lea.hbm %s1433_s16, 512  ;;  %s1020_s20 = scalar_lea.hbm %s1494_s7, 1024 }
 0x38d   : > { %p1017_p6 = scmp.ne.s32.totalorder %s1433_s16, %s1016_s9  ;;  %p1021_p11 = scmp.lt.u32.totalorder %s1433_s16, %s1494_s7 }
 0x38e   : > { %p1022_p0 = scmp.lt.u32.totalorder %s1020_s20, %s1016_s9  ;;  %p1024_p9 = scmp.lt.u32.totalorder %s1016_s9, %s1433_s16 }
 0x38f   : > { %p1018_p8 = pnand %p1017_p6, %p1245_p10 }
 0x390   : > { %p1023_p5 = por %p1022_p0, %p1021_p11 }
 0x391   : > { %p1019_p12 = pneg %p1018_p8 }
 0x392   : > { %p1025_p1 = por %p1024_p9, %p1023_p5 }
 0x394   : > { %p1026_p2 = pnand %p1025_p1, %p1019_p12 }
 0x396   : > { %1029 = shalt.err (!%p1026_p2)
}
 0x397   : > { %797 = dma.vmem_to_hbm [thread:$0]  (%p1245_p10), %s1427_s30, 512, %s1433_s16, %s1397_s13, %s1107_s17, %s1107_s17, %s1108_s12  }
 0x398 PF: > { %s592_s22 = sand.u32 1, %s1072_s24   ;;  %p1518_p7 = scmp.ne.s32.totalorder %s1504_s10, 0 }
 0x399   : > { %p1519_p3 = scmp.ge.s32.totalorder %s1092_s29, 2  ;;  %s593_s11 = scalar_lea.sflag [#allocation4], %s592_s22 }
 0x39b   : > { %p810_p4 = pnand %p1519_p3, %p1518_p7 }
 0x39d   : > { %1063 = dma.done.wait (!%p810_p4), %s593_s11, 512  }
 0x39e   : > { %1065 = vsyncadd (!%p810_p4), %s593_s11, 4294966784  ;;  %s1520_s21 = sadd.s32 4294967294, %s1092_s29  }
 0x39f   : > { %s601_s15 = sand.u32 1, %s1520_s21  }
 0x3a0   : > { %s602_s19 = scalar_lea.sflag [#allocation9], %s601_s15 }
 0x3a1   : > { %1067 = dma.done.wait (!%p810_p4), %s602_s19, 1024  }
 0x3a2   : > { %1069 = vsyncadd (!%p810_p4), %s602_s19, 4294966272  ;;  %s28_s29 = sadd.s32 1, %s1092_s29   ;;  %s1521_s17 = sld [smem:[#allocation15_spill]] }
 0x3a3   : > { %p25_p10 = scmp.ge.s32.totalorder %s28_s29, 4   ;;  %s1522_s24 = smov %s1076_s25 }
 0x3a4   : > { %s1523_s25 = smov %s1080_s26  ;;  %s1524_s26 = smov %s1254_s23 }
 0x3a5   : > { %s1525_s27 = smov %s1088_s28  ;;  %27 = sbr.rel (!%p25_p10) target bundleno = 11 (0xb), region = 121 }
 0x3a8   : > { %s1526_s28 = smov %s1521_s17 }
 0x3ac   :  { %616 = vsyncpa [#allocation3], 1 }
 0x3ad   :  { %618 = vsyncpa [#allocation3 + $0x1], 1 }
 0x3ae   :  { %619 = vsyncpa [#allocation6], 1 }
 0x3af   :  { %620 = vsyncpa [#allocation4], 1 }
 0x3b0   :  { %622 = vsyncpa [#allocation4 + $0x1], 1 }
 0x3b1   :  { %623 = vsyncpa [#allocation9], 1 }
 0x3b2   :  { %625 = vsyncpa [#allocation9 + $0x1], 1 }

</bundles_post_ra>
